<compile_context>
chip_gen: v7x
topology: tpu7x:2x2x1
jax: 0.10.0
libtpu: 0.0.40
codegen_flags: <defaults>
</compile_context>

<pallas_src>
import numpy as np
import jax
import jax.numpy as jnp
from jax.experimental import pallas as pl
from jax.experimental.pallas import tpu as pltpu

LATENT = 16
HIDDEN = 32
TARGET = 100                  # Linear(16 -> 100)

D1 = (HIDDEN * 2) * 2 * 2     # 256  (64 ch, 2x2)
D2 = HIDDEN * 4 * 4           # 512  (32 ch, 4x4)
D3 = 1 * 4 * 4                # 16   (1 ch, 4x4)  == Flatten output
PACK3 = 128                   # packed layer-3 width: 3 branches x 16 lanes -> 128
OUT_PAD = 128                 # 100-wide Linear output padded to a full lane width


def convT_to_matrix(w, in_hw, stride, pad, out_hw):
    """Unfold a ConvTranspose2d weight (Cin, Cout, KH, KW) into a dense matrix
    of shape (Cin*Hi*Wi, Cout*Ho*Wo) using NCHW-flatten ordering."""
    cin, cout, KH, KW = w.shape
    hi, wi = in_hw
    ho, wo = out_hw
    M = np.zeros((cin * hi * wi, cout * ho * wo), dtype=np.float32)
    for ci in range(cin):
        for h in range(hi):
            for ww in range(wi):
                row = ci * hi * wi + h * wi + ww
                for kh in range(KH):
                    for kw in range(KW):
                        oi = h * stride - pad + kh
                        oj = ww * stride - pad + kw
                        if 0 <= oi < ho and 0 <= oj < wo:
                            # columns co*Ho*Wo + oi*Wo + oj, for all co
                            M[row, oi * wo + oj::ho * wo] += w[ci, :, kh, kw]
    return M


def build_decoder_params(key):
    """Deterministic synthetic parameters for one decoder branch, already
    converted to matmul form (unpadded, f32 numpy)."""
    ks = jax.random.split(key, 8)
    s = 0.1
    w1 = s * jax.random.normal(ks[0], (LATENT, HIDDEN * 2, 3, 3), jnp.float32)
    b1 = s * jax.random.normal(ks[1], (HIDDEN * 2,), jnp.float32)
    w2 = s * jax.random.normal(ks[2], (HIDDEN * 2, HIDDEN, 3, 3), jnp.float32)
    b2 = s * jax.random.normal(ks[3], (HIDDEN,), jnp.float32)
    w3 = s * jax.random.normal(ks[4], (HIDDEN, 1, 3, 3), jnp.float32)
    b3 = s * jax.random.normal(ks[5], (1,), jnp.float32)
    lw = s * jax.random.normal(ks[6], (TARGET, D3), jnp.float32)  # torch Linear: (out, in)
    lb = s * jax.random.normal(ks[7], (TARGET,), jnp.float32)

    # ConvTranspose2d(16, 64, k=3, s=2, p=1, op=1): 1x1 -> 2x2
    M1 = convT_to_matrix(np.asarray(w1), (1, 1), 2, 1, (2, 2))
    B1 = np.repeat(np.asarray(b1), 2 * 2)
    # ConvTranspose2d(64, 32, k=3, s=2, p=1, op=1): 2x2 -> 4x4
    M2 = convT_to_matrix(np.asarray(w2), (2, 2), 2, 1, (4, 4))
    B2 = np.repeat(np.asarray(b2), 4 * 4)
    # ConvTranspose2d(32, 1, k=3, s=1, p=1): 4x4 -> 4x4
    M3 = convT_to_matrix(np.asarray(w3), (4, 4), 1, 1, (4, 4))
    B3 = np.repeat(np.asarray(b3), 4 * 4)
    # Linear(16, 100): y = x @ W.T + b
    W4 = np.asarray(lw).T.astype(np.float32)
    B4 = np.asarray(lb).astype(np.float32)
    return (M1, B1, M2, B2, M3, B3, W4, B4)


def build_all_params(key):
    """Build kernel params (fused / lane-packed / bf16 weights) and unpadded
    f32 reference params for the 3 decoder branches."""
    keys = jax.random.split(key, 3)
    per = [build_decoder_params(k) for k in keys]
    M1s, B1s, M2s, B2s, M3s, B3s, W4s, B4s = zip(*per)

    # layer 1: all branches see the same z -> concat into one (16, 768) matmul
    M1c = np.concatenate(M1s, axis=1)                       # (16, 3*256)
    B1c = np.concatenate(B1s)[None, :]                      # (1, 3*256)
    # layer 2: stacked per-branch (256, 512)
    M2k = np.stack(M2s)                                     # (3, 256, 512)
    B2k = np.stack(B2s)[:, None, :]                         # (3, 1, 512)
    # layer 3: each branch's (512, 16) output packed into lanes [16d, 16d+16)
    # of one shared 128-wide buffer; the kernel accumulates across branches.
    M3k = np.zeros((3, D2, PACK3), np.float32)              # (3, 512, 128)
    B3k = np.zeros((1, PACK3), np.float32)                  # (1, 128)
    for d in range(3):
        M3k[d, :, d * D3:(d + 1) * D3] = M3s[d]
        B3k[0, d * D3:(d + 1) * D3] = B3s[d]
    # layer 4: block-diagonal Linear over the packed h3:
    # rows [16d, 16d+16) x cols [128d, 128d+100) hold branch d's (16, 100) W.
    W4k = np.zeros((PACK3, 3 * OUT_PAD), np.float32)        # (128, 384)
    B4k = np.zeros((1, 3 * OUT_PAD), np.float32)            # (1, 384)
    for d in range(3):
        W4k[d * D3:(d + 1) * D3, d * OUT_PAD:d * OUT_PAD + TARGET] = W4s[d]
        B4k[0, d * OUT_PAD:d * OUT_PAD + TARGET] = B4s[d]

    kernel_params = (
        jnp.asarray(M1c, jnp.bfloat16), jnp.asarray(B1c, jnp.bfloat16),
        jnp.asarray(M2k, jnp.bfloat16), jnp.asarray(B2k, jnp.bfloat16),
        jnp.asarray(M3k, jnp.bfloat16), jnp.asarray(B3k, jnp.bfloat16),
        jnp.asarray(W4k, jnp.bfloat16), jnp.asarray(B4k, jnp.float32),
    )
    ref_params = tuple(
        (jnp.asarray(M1s[d]), jnp.asarray(B1s[d])[None, :],
         jnp.asarray(M2s[d]), jnp.asarray(B2s[d])[None, :],
         jnp.asarray(M3s[d]), jnp.asarray(B3s[d])[None, :],
         jnp.asarray(W4s[d]), jnp.asarray(B4s[d])[None, :])
        for d in range(3))
    return kernel_params, ref_params


# --------------------------- Pallas kernel -----------------------------------

def decoder_kernel(z_ref, m1_ref, b1_ref, m2_ref, b2_ref, m3_ref, b3_ref,
                   w4_ref, b4_ref, out_ref):
    # z_ref: (tm, 16) bf16; weights bf16; dots accumulate in f32 on the MXU;
    # bias-add + tanh run in bf16 (cheap on v6e/v7x EUP/VPU).
    z = z_ref[...]                                                  # (tm, 16)

    # layer 1, all 3 branches fused: (tm, 16) @ (16, 768)
    s1 = jnp.dot(z, m1_ref[...], preferred_element_type=jnp.float32)
    h1 = jnp.tanh(s1.astype(jnp.bfloat16) + b1_ref[...])            # (tm, 768)

    # layers 2 + 3: per-branch (tm,256)@(256,512), then scatter each branch's
    # 16-wide layer-3 output into lanes [16d,16d+16) of one shared (tm, 128)
    # accumulator (the packed M3 matrices are zero outside their lane block).
    s3 = None
    for d in range(3):                                              # static unroll
        h1_d = h1[:, d * D1:(d + 1) * D1]                           # (tm, 256)
        s2 = jnp.dot(h1_d, m2_ref[d], preferred_element_type=jnp.float32)
        h2 = jnp.tanh(s2.astype(jnp.bfloat16) + b2_ref[d])          # (tm, 512)
        p = jnp.dot(h2, m3_ref[d], preferred_element_type=jnp.float32)  # (tm, 128)
        s3 = p if s3 is None else s3 + p
    h3 = jnp.tanh(s3.astype(jnp.bfloat16) + b3_ref[...])            # (tm, 128)

    # layer 4: block-diagonal Linear for all branches in one matmul
    # (tm, 128) @ (128, 384); final bias + tanh in f32, single lane-dense store.
    s4 = jnp.dot(h3, w4_ref[...], preferred_element_type=jnp.float32)
    out_ref[...] = jnp.tanh(s4 + b4_ref[...])                       # (tm, 384)


def _round16(x):
    return ((x + 15) // 16) * 16


def _choose_tm(N):
    """Batch-tile size: big tiles to amortize the ~0.35us/step grid overhead,
    but at least 2 tiles for mid/large N so v7x's two TensorCores both get
    work on the 'parallel' axis; tiles capped at 1024 rows (VMEM headroom)."""
    n16 = _round16(max(N, 1))
    if n16 < 256:
        return n16
    return min(1024, _round16((n16 + 1) // 2))


def single_mask_decoder(z, batch_size, time, regions, kernel_params):
    """Equivalent of SingleMaskDecoder.forward(z, batch_size, time, regions).
    Returns (speed, inflow, demand), each (N, 100) f32."""
    N = batch_size * time * regions
    z2 = z.reshape(N, -1).astype(jnp.bfloat16)     # == z.view(N, latent, 1, 1)
    assert z2.shape[1] == LATENT

    tm = _choose_tm(N)
    nt = pl.cdiv(N, tm)
    n_pad = nt * tm
    zp = jnp.pad(z2, ((0, n_pad - N), (0, 0)))

    out = pl.pallas_call(
        decoder_kernel,
        out_shape=jax.ShapeDtypeStruct((n_pad, 3 * OUT_PAD), jnp.float32),
        grid_spec=pltpu.PrefetchScalarGridSpec(
            num_scalar_prefetch=0,
            grid=(nt,),                                   # batch tiles only
            in_specs=[
                pl.BlockSpec((tm, LATENT), lambda n: (n, 0)),
                pl.BlockSpec((LATENT, 3 * D1), lambda n: (0, 0)),
                pl.BlockSpec((1, 3 * D1), lambda n: (0, 0)),
                pl.BlockSpec((3, D1, D2), lambda n: (0, 0, 0)),
                pl.BlockSpec((3, 1, D2), lambda n: (0, 0, 0)),
                pl.BlockSpec((3, D2, PACK3), lambda n: (0, 0, 0)),
                pl.BlockSpec((1, PACK3), lambda n: (0, 0)),
                pl.BlockSpec((PACK3, 3 * OUT_PAD), lambda n: (0, 0)),
                pl.BlockSpec((1, 3 * OUT_PAD), lambda n: (0, 0)),
            ],
            out_specs=pl.BlockSpec((tm, 3 * OUT_PAD), lambda n: (n, 0)),
        ),
        compiler_params=pltpu.CompilerParams(
            dimension_semantics=("parallel",),
            vmem_limit_bytes=32 * 1024 * 1024),
    )(zp, *kernel_params)

    # drop the row padding and the per-branch 100->128 lane padding
    speed = out[:N, 0 * OUT_PAD:0 * OUT_PAD + TARGET]
    inflow = out[:N, 1 * OUT_PAD:1 * OUT_PAD + TARGET]
    demand = out[:N, 2 * OUT_PAD:2 * OUT_PAD + TARGET]
    return speed, inflow, demand


# --------------------------- reference & test --------------------------------

def reference(z2, ref_params):
    """Plain-JAX f32 reference of the matmul chain (torch module semantics)."""
    outs = []
    for (M1, B1, M2, B2, M3, B3, W4, B4) in ref_params:
        h = jnp.tanh(z2 @ M1 + B1)
        h = jnp.tanh(h @ M2 + B2)
        h = jnp.tanh(h @ M3 + B3)
        outs.append(jnp.tanh(h @ W4 + B4))
    return tuple(outs)


def _check(z, batch_size, time, regions, kernel_params, ref_params, tol):
    speed, inflow, demand = single_mask_decoder(z, batch_size, time, regions,
                                                kernel_params)
    jax.block_until_ready((speed, inflow, demand))
    N = batch_size * time * regions
    z2 = z.reshape(N, LATENT).astype(jnp.float32)
    rs, ri, rd = reference(z2, ref_params)
    np.testing.assert_allclose(np.asarray(speed), np.asarray(rs), rtol=tol, atol=tol)
    np.testing.assert_allclose(np.asarray(inflow), np.asarray(ri), rtol=tol, atol=tol)
    np.testing.assert_allclose(np.asarray(demand), np.asarray(rd), rtol=tol, atol=tol)
    assert speed.shape == (N, TARGET) and inflow.shape == (N, TARGET) \
        and demand.shape == (N, TARGET)


if __name__ == "__main__":
    key = jax.random.PRNGKey(0)
    pkey, zkey1, zkey2 = jax.random.split(key, 3)

    kernel_params, ref_params = build_all_params(pkey)

    # small case (single tile): batch=2, time=2, regions=2 -> N = 8
    z_small = jax.random.normal(zkey1, (2, 2, 2, LATENT), jnp.float32)
    _check(z_small, 2, 2, 2, kernel_params, ref_params, tol=3e-2)

    # multi-tile case (exercises the grid / index_map path and nt >= 2):
    # batch=4, time=8, regions=20 -> N = 640 -> two 320-row tiles
    z_big = jax.random.normal(zkey2, (4, 8, 20, LATENT), jnp.float32)
    _check(z_big, 4, 8, 20, kernel_params, ref_params, tol=3e-2)

    print("KERNEL_OK")
</pallas_src>

<mosaic_0001>
module attributes {stable_mosaic.version = 11 : i64} {
  func.func @decoder_kernel(%arg0: i32, %arg1: memref<16x16xbf16, #tpu.memory_space<vmem>>, %arg2: memref<16x768xbf16, #tpu.memory_space<vmem>>, %arg3: memref<1x768xbf16, #tpu.memory_space<vmem>>, %arg4: memref<3x256x512xbf16, #tpu.memory_space<vmem>>, %arg5: memref<3x1x512xbf16, #tpu.memory_space<vmem>>, %arg6: memref<3x512x128xbf16, #tpu.memory_space<vmem>>, %arg7: memref<1x128xbf16, #tpu.memory_space<vmem>>, %arg8: memref<128x384xbf16, #tpu.memory_space<vmem>>, %arg9: memref<1x384xf32, #tpu.memory_space<vmem>>, %arg10: memref<16x384xf32, #tpu.memory_space<vmem>>) attributes {dimension_semantics = [#tpu.dimension_semantics<parallel>], iteration_bounds = array<i64: 1>, scalar_prefetch = 0 : i64, scratch_operands = 0 : i64, tpu.core_type = #tpu.core_type<tc>, window_params = [{transform_indices = @transform_0, window_bounds = array<i64: 16, 16>}, {pipeline_mode = #tpu.pipeline_mode<synchronous>, transform_indices = @transform_1, window_bounds = array<i64: 16, 768>}, {pipeline_mode = #tpu.pipeline_mode<synchronous>, transform_indices = @transform_2, window_bounds = array<i64: 1, 768>}, {pipeline_mode = #tpu.pipeline_mode<synchronous>, transform_indices = @transform_3, window_bounds = array<i64: 3, 256, 512>}, {pipeline_mode = #tpu.pipeline_mode<synchronous>, transform_indices = @transform_4, window_bounds = array<i64: 3, 1, 512>}, {pipeline_mode = #tpu.pipeline_mode<synchronous>, transform_indices = @transform_5, window_bounds = array<i64: 3, 512, 128>}, {pipeline_mode = #tpu.pipeline_mode<synchronous>, transform_indices = @transform_6, window_bounds = array<i64: 1, 128>}, {pipeline_mode = #tpu.pipeline_mode<synchronous>, transform_indices = @transform_7, window_bounds = array<i64: 128, 384>}, {pipeline_mode = #tpu.pipeline_mode<synchronous>, transform_indices = @transform_8, window_bounds = array<i64: 1, 384>}, {transform_indices = @transform_9, window_bounds = array<i64: 16, 384>}]} {
    %c0 = arith.constant 0 : index
    %c0_0 = arith.constant 0 : index
    %0 = vector.load %arg1[%c0, %c0_0] : memref<16x16xbf16, #tpu.memory_space<vmem>>, vector<16x16xbf16>
    %c0_1 = arith.constant 0 : index
    %c0_2 = arith.constant 0 : index
    %1 = vector.load %arg2[%c0_1, %c0_2] : memref<16x768xbf16, #tpu.memory_space<vmem>>, vector<16x768xbf16>
    %cst = arith.constant dense<0.000000e+00> : vector<16x768xf32>
    %2 = tpu.matmul %0, %1, %cst {dimension_numbers = #tpu.dot_dimension_numbers<[1], [0], [0], [1], [0, 0, 1, 1], [], []>} : vector<16x16xbf16>, vector<16x768xbf16>, vector<16x768xf32> -> vector<16x768xf32>
    %3 = arith.truncf %2 : vector<16x768xf32> to vector<16x768xbf16>
    %c0_3 = arith.constant 0 : index
    %c0_4 = arith.constant 0 : index
    %4 = vector.load %arg3[%c0_3, %c0_4] : memref<1x768xbf16, #tpu.memory_space<vmem>>, vector<1x768xbf16>
    %5 = vector.broadcast %4 : vector<1x768xbf16> to vector<16x768xbf16>
    %6 = arith.addf %3, %5 : vector<16x768xbf16>
    %7 = math.tanh %6 : vector<16x768xbf16>
    %8 = vector.extract_strided_slice %7 {offsets = [0, 0], sizes = [16, 256], strides = [1, 1]} : vector<16x768xbf16> to vector<16x256xbf16>
    %c0_5 = arith.constant 0 : index
    %c0_6 = arith.constant 0 : index
    %c0_7 = arith.constant 0 : index
    %9 = vector.load %arg4[%c0_5, %c0_6, %c0_7] : memref<3x256x512xbf16, #tpu.memory_space<vmem>>, vector<1x256x512xbf16>
    %10 = vector.shape_cast %9 : vector<1x256x512xbf16> to vector<256x512xbf16>
    %cst_8 = arith.constant dense<0.000000e+00> : vector<16x512xf32>
    %11 = tpu.matmul %8, %10, %cst_8 {dimension_numbers = #tpu.dot_dimension_numbers<[1], [0], [0], [1], [0, 0, 1, 1], [], []>} : vector<16x256xbf16>, vector<256x512xbf16>, vector<16x512xf32> -> vector<16x512xf32>
    %12 = arith.truncf %11 : vector<16x512xf32> to vector<16x512xbf16>
    %c0_9 = arith.constant 0 : index
    %c0_10 = arith.constant 0 : index
    %c0_11 = arith.constant 0 : index
    %13 = vector.load %arg5[%c0_9, %c0_10, %c0_11] : memref<3x1x512xbf16, #tpu.memory_space<vmem>>, vector<1x1x512xbf16>
    %14 = vector.shape_cast %13 : vector<1x1x512xbf16> to vector<1x512xbf16>
    %15 = vector.broadcast %14 : vector<1x512xbf16> to vector<16x512xbf16>
    %16 = arith.addf %12, %15 : vector<16x512xbf16>
    %17 = math.tanh %16 : vector<16x512xbf16>
    %c0_12 = arith.constant 0 : index
    %c0_13 = arith.constant 0 : index
    %c0_14 = arith.constant 0 : index
    %18 = vector.load %arg6[%c0_12, %c0_13, %c0_14] : memref<3x512x128xbf16, #tpu.memory_space<vmem>>, vector<1x512x128xbf16>
    %19 = vector.shape_cast %18 : vector<1x512x128xbf16> to vector<512x128xbf16>
    %cst_15 = arith.constant dense<0.000000e+00> : vector<16x128xf32>
    %20 = tpu.matmul %17, %19, %cst_15 {dimension_numbers = #tpu.dot_dimension_numbers<[1], [0], [0], [1], [0, 0, 1, 1], [], []>} : vector<16x512xbf16>, vector<512x128xbf16>, vector<16x128xf32> -> vector<16x128xf32>
    %21 = vector.extract_strided_slice %7 {offsets = [0, 256], sizes = [16, 256], strides = [1, 1]} : vector<16x768xbf16> to vector<16x256xbf16>
    %c1 = arith.constant 1 : index
    %c0_16 = arith.constant 0 : index
    %c0_17 = arith.constant 0 : index
    %22 = vector.load %arg4[%c1, %c0_16, %c0_17] : memref<3x256x512xbf16, #tpu.memory_space<vmem>>, vector<1x256x512xbf16>
    %23 = vector.shape_cast %22 : vector<1x256x512xbf16> to vector<256x512xbf16>
    %cst_18 = arith.constant dense<0.000000e+00> : vector<16x512xf32>
    %24 = tpu.matmul %21, %23, %cst_18 {dimension_numbers = #tpu.dot_dimension_numbers<[1], [0], [0], [1], [0, 0, 1, 1], [], []>} : vector<16x256xbf16>, vector<256x512xbf16>, vector<16x512xf32> -> vector<16x512xf32>
    %25 = arith.truncf %24 : vector<16x512xf32> to vector<16x512xbf16>
    %c1_19 = arith.constant 1 : index
    %c0_20 = arith.constant 0 : index
    %c0_21 = arith.constant 0 : index
    %26 = vector.load %arg5[%c1_19, %c0_20, %c0_21] : memref<3x1x512xbf16, #tpu.memory_space<vmem>>, vector<1x1x512xbf16>
    %27 = vector.shape_cast %26 : vector<1x1x512xbf16> to vector<1x512xbf16>
    %28 = vector.broadcast %27 : vector<1x512xbf16> to vector<16x512xbf16>
    %29 = arith.addf %25, %28 : vector<16x512xbf16>
    %30 = math.tanh %29 : vector<16x512xbf16>
    %c1_22 = arith.constant 1 : index
    %c0_23 = arith.constant 0 : index
    %c0_24 = arith.constant 0 : index
    %31 = vector.load %arg6[%c1_22, %c0_23, %c0_24] : memref<3x512x128xbf16, #tpu.memory_space<vmem>>, vector<1x512x128xbf16>
    %32 = vector.shape_cast %31 : vector<1x512x128xbf16> to vector<512x128xbf16>
    %cst_25 = arith.constant dense<0.000000e+00> : vector<16x128xf32>
    %33 = tpu.matmul %30, %32, %cst_25 {dimension_numbers = #tpu.dot_dimension_numbers<[1], [0], [0], [1], [0, 0, 1, 1], [], []>} : vector<16x512xbf16>, vector<512x128xbf16>, vector<16x128xf32> -> vector<16x128xf32>
    %34 = arith.addf %20, %33 : vector<16x128xf32>
    %35 = vector.extract_strided_slice %7 {offsets = [0, 512], sizes = [16, 256], strides = [1, 1]} : vector<16x768xbf16> to vector<16x256xbf16>
    %c2 = arith.constant 2 : index
    %c0_26 = arith.constant 0 : index
    %c0_27 = arith.constant 0 : index
    %36 = vector.load %arg4[%c2, %c0_26, %c0_27] : memref<3x256x512xbf16, #tpu.memory_space<vmem>>, vector<1x256x512xbf16>
    %37 = vector.shape_cast %36 : vector<1x256x512xbf16> to vector<256x512xbf16>
    %cst_28 = arith.constant dense<0.000000e+00> : vector<16x512xf32>
    %38 = tpu.matmul %35, %37, %cst_28 {dimension_numbers = #tpu.dot_dimension_numbers<[1], [0], [0], [1], [0, 0, 1, 1], [], []>} : vector<16x256xbf16>, vector<256x512xbf16>, vector<16x512xf32> -> vector<16x512xf32>
    %39 = arith.truncf %38 : vector<16x512xf32> to vector<16x512xbf16>
    %c2_29 = arith.constant 2 : index
    %c0_30 = arith.constant 0 : index
    %c0_31 = arith.constant 0 : index
    %40 = vector.load %arg5[%c2_29, %c0_30, %c0_31] : memref<3x1x512xbf16, #tpu.memory_space<vmem>>, vector<1x1x512xbf16>
    %41 = vector.shape_cast %40 : vector<1x1x512xbf16> to vector<1x512xbf16>
    %42 = vector.broadcast %41 : vector<1x512xbf16> to vector<16x512xbf16>
    %43 = arith.addf %39, %42 : vector<16x512xbf16>
    %44 = math.tanh %43 : vector<16x512xbf16>
    %c2_32 = arith.constant 2 : index
    %c0_33 = arith.constant 0 : index
    %c0_34 = arith.constant 0 : index
    %45 = vector.load %arg6[%c2_32, %c0_33, %c0_34] : memref<3x512x128xbf16, #tpu.memory_space<vmem>>, vector<1x512x128xbf16>
    %46 = vector.shape_cast %45 : vector<1x512x128xbf16> to vector<512x128xbf16>
    %cst_35 = arith.constant dense<0.000000e+00> : vector<16x128xf32>
    %47 = tpu.matmul %44, %46, %cst_35 {dimension_numbers = #tpu.dot_dimension_numbers<[1], [0], [0], [1], [0, 0, 1, 1], [], []>} : vector<16x512xbf16>, vector<512x128xbf16>, vector<16x128xf32> -> vector<16x128xf32>
    %48 = arith.addf %34, %47 : vector<16x128xf32>
    %49 = arith.truncf %48 : vector<16x128xf32> to vector<16x128xbf16>
    %c0_36 = arith.constant 0 : index
    %c0_37 = arith.constant 0 : index
    %50 = vector.load %arg7[%c0_36, %c0_37] : memref<1x128xbf16, #tpu.memory_space<vmem>>, vector<1x128xbf16>
    %51 = vector.broadcast %50 : vector<1x128xbf16> to vector<16x128xbf16>
    %52 = arith.addf %49, %51 : vector<16x128xbf16>
    %53 = math.tanh %52 : vector<16x128xbf16>
    %c0_38 = arith.constant 0 : index
    %c0_39 = arith.constant 0 : index
    %54 = vector.load %arg8[%c0_38, %c0_39] : memref<128x384xbf16, #tpu.memory_space<vmem>>, vector<128x384xbf16>
    %cst_40 = arith.constant dense<0.000000e+00> : vector<16x384xf32>
    %55 = tpu.matmul %53, %54, %cst_40 {dimension_numbers = #tpu.dot_dimension_numbers<[1], [0], [0], [1], [0, 0, 1, 1], [], []>} : vector<16x128xbf16>, vector<128x384xbf16>, vector<16x384xf32> -> vector<16x384xf32>
    %c0_41 = arith.constant 0 : index
    %c0_42 = arith.constant 0 : index
    %56 = vector.load %arg9[%c0_41, %c0_42] : memref<1x384xf32, #tpu.memory_space<vmem>>, vector<1x384xf32>
    %57 = vector.broadcast %56 : vector<1x384xf32> to vector<16x384xf32>
    %58 = arith.addf %55, %57 : vector<16x384xf32>
    %59 = math.tanh %58 : vector<16x384xf32>
    %c0_43 = arith.constant 0 : index
    %c0_44 = arith.constant 0 : index
    %60 = vector.load %arg10[%c0_43, %c0_44] : memref<16x384xf32, #tpu.memory_space<vmem>>, vector<16x384xf32>
    tpu.vector_store %arg10[%c0_43, %c0_44], %59 {strides = array<i32>} : memref<16x384xf32, #tpu.memory_space<vmem>>, vector<16x384xf32>,
    return
  }
  func.func @transform_0(%arg0: i32) -> (i32, i32) {
    %c0_i32 = arith.constant 0 : i32
    %c0_i32_0 = arith.constant 0 : i32
    return %arg0, %c0_i32 : i32, i32
  }
  func.func @transform_1(%arg0: i32) -> (i32, i32) {
    %c0_i32 = arith.constant 0 : i32
    %c0_i32_0 = arith.constant 0 : i32
    %c0_i32_1 = arith.constant 0 : i32
    return %c0_i32, %c0_i32_0 : i32, i32
  }
  func.func @transform_2(%arg0: i32) -> (i32, i32) {
    %c0_i32 = arith.constant 0 : i32
    %c0_i32_0 = arith.constant 0 : i32
    %c0_i32_1 = arith.constant 0 : i32
    return %c0_i32, %c0_i32_0 : i32, i32
  }
  func.func @transform_3(%arg0: i32) -> (i32, i32, i32) {
    %c0_i32 = arith.constant 0 : i32
    %c0_i32_0 = arith.constant 0 : i32
    %c0_i32_1 = arith.constant 0 : i32
    %c0_i32_2 = arith.constant 0 : i32
    return %c0_i32, %c0_i32_0, %c0_i32_1 : i32, i32, i32
  }
  func.func @transform_4(%arg0: i32) -> (i32, i32, i32) {
    %c0_i32 = arith.constant 0 : i32
    %c0_i32_0 = arith.constant 0 : i32
    %c0_i32_1 = arith.constant 0 : i32
    %c0_i32_2 = arith.constant 0 : i32
    return %c0_i32, %c0_i32_0, %c0_i32_1 : i32, i32, i32
  }
  func.func @transform_5(%arg0: i32) -> (i32, i32, i32) {
    %c0_i32 = arith.constant 0 : i32
    %c0_i32_0 = arith.constant 0 : i32
    %c0_i32_1 = arith.constant 0 : i32
    %c0_i32_2 = arith.constant 0 : i32
    return %c0_i32, %c0_i32_0, %c0_i32_1 : i32, i32, i32
  }
  func.func @transform_6(%arg0: i32) -> (i32, i32) {
    %c0_i32 = arith.constant 0 : i32
    %c0_i32_0 = arith.constant 0 : i32
    %c0_i32_1 = arith.constant 0 : i32
    return %c0_i32, %c0_i32_0 : i32, i32
  }
  func.func @transform_7(%arg0: i32) -> (i32, i32) {
    %c0_i32 = arith.constant 0 : i32
    %c0_i32_0 = arith.constant 0 : i32
    %c0_i32_1 = arith.constant 0 : i32
    return %c0_i32, %c0_i32_0 : i32, i32
  }
  func.func @transform_8(%arg0: i32) -> (i32, i32) {
    %c0_i32 = arith.constant 0 : i32
    %c0_i32_0 = arith.constant 0 : i32
    %c0_i32_1 = arith.constant 0 : i32
    return %c0_i32, %c0_i32_0 : i32, i32
  }
  func.func @transform_9(%arg0: i32) -> (i32, i32) {
    %c0_i32 = arith.constant 0 : i32
    %c0_i32_0 = arith.constant 0 : i32
    return %arg0, %c0_i32 : i32, i32
  }
}

</mosaic_0001>

<bundles_post_ra>
// kernel: tpu_custom_call.1
= control target key start
LH: loop header
LB: loop body
LE: loop exit
PB: predicated region body
PF: predicated region fallthrough
CT: control target
= control target key end

     0   :  { %14 = vsyncpa [#allocation3], 0  ;;  %s4675_s0 = inlined_call_operand.vmem [shape: bf16[16,16], index: 0, kind: input, shape index: {}]   ;;  %s4676_s1 = inlined_call_operand.hbm [shape: bf16[16,768], index: 1, kind: input, shape index: {}]   ;;  %s4677_s2 = inlined_call_operand.vmem [shape: bf16[1,768], index: 2, kind: input, shape index: {}]   ;;  %s4678_s3 = inlined_call_operand.hbm [shape: bf16[3,256,512], index: 3, kind: input, shape index: {}]   ;;  %s4679_s4 = inlined_call_operand.vmem [shape: bf16[3,1,512], index: 4, kind: input, shape index: {}]   ;;  %s4680_s5 = inlined_call_operand.hbm [shape: bf16[3,512,128], index: 5, kind: input, shape index: {}]   ;;  %s4681_s6 = inlined_call_operand.vmem [shape: bf16[1,128], index: 6, kind: input, shape index: {}]   ;;  %s4682_s7 = inlined_call_operand.hbm [shape: bf16[128,384], index: 7, kind: input, shape index: {}]   ;;  %s4683_s8 = inlined_call_operand.vmem [shape: f32[1,384], index: 8, kind: input, shape index: {}]   ;;  %s4684_s9 = inlined_call_operand.hbm [shape: f32[16,384], index: 9, kind: output, shape index: {}]  }
   0x1   :  { %15 = vsyncpa [#allocation6], 0 }
   0x2   :  { %16 = vsyncpa [#allocation9], 0 }
   0x3   :  { %17 = vsyncpa [#allocation4], 0  ;;  %s4407_s30 = smov [#allocation5]   ;;  %s4289_s13 = scalar_lea.hbm %s4678_s3, 24576 }
   0x4   :  { %s39_s10 = sshll.u32 %s4407_s30, 4  ;;  %p4290_p0 = scmp.ne.s32.totalorder %s4678_s3, %s4289_s13  ;;  %s40_s10 = int_to_ptr.vmem [resolvable:$true] %s39_s10 }
   0x5   :  { %p4293_p1 = scmp.lt.u32.totalorder %s4289_s13, %s4678_s3 }
   0x7   :  { %p4295_p2 = pnand %p4293_p1, %p4290_p0 }
   0x9   :  { %4298 = shalt.err (!%p4295_p2)
}
   0xa   :  { %s4299_s18 = scalar_lea.vmem %s40_s10, 24576  ;;  %p4304_p4 = scmp.lt.s32.totalorder %s40_s10, %s40_s10 }
   0xb   :  { %p4300_p3 = scmp.ne.s32.totalorder %s40_s10, %s4299_s18  ;;  %p4305_p5 = scmp.lt.s32.totalorder %s4299_s18, %s4299_s18 }
   0xd   :  { %p4306_p6 = por %p4305_p5, %p4304_p4 }
   0xf   :  { %p4307_p7 = pnand %p4306_p6, %p4300_p3 }
  0x11   :  { %4310 = shalt.err (!%p4307_p7)
}
  0x12   :  { %s4408_s19 = smov 256   ;;  %s4409_s20 = smov 16  }
  0x13   :  { %45 = dma.hbm_to_vmem [thread:$0]  %s4678_s3, 24576, %s40_s10, [#allocation6], %s4408_s19, %s4408_s19, %s4409_s20  }
  0x14   :  { %s4410_s23 = smov [#allocation2]   ;;  %s4311_s27 = scalar_lea.hbm %s4676_s1, 768 }
  0x15   :  { %s25_s24 = sshll.u32 %s4410_s23, 4  ;;  %p4312_p8 = scmp.ne.s32.totalorder %s4676_s1, %s4311_s27  ;;  %s26_s24 = int_to_ptr.vmem [resolvable:$true] %s25_s24 }
  0x16   :  { %p4315_p9 = scmp.lt.u32.totalorder %s4311_s27, %s4676_s1 }
  0x18   :  { %p4317_p10 = pnand %p4315_p9, %p4312_p8 }
  0x1a   :  { %4320 = shalt.err (!%p4317_p10)
}
  0x1b   :  { %s4321_s12 = scalar_lea.vmem %s26_s24, 768  ;;  %p4326_p12 = scmp.lt.s32.totalorder %s26_s24, %s26_s24 }
  0x1c   :  { %p4322_p11 = scmp.ne.s32.totalorder %s26_s24, %s4321_s12  ;;  %p4327_p13 = scmp.lt.s32.totalorder %s4321_s12, %s4321_s12 }
  0x1e   :  { %p4328_p0 = por %p4327_p13, %p4326_p12 }
  0x20   :  { %p4329_p1 = pnand %p4328_p0, %p4322_p11 }
  0x22   :  { %4332 = shalt.err (!%p4329_p1)
}
  0x23   :  { %s4411_s3 = smov 384   ;;  %s4412_s10 = smov 24  }
  0x24   :  { %31 = dma.hbm_to_vmem [thread:$0]  %s4676_s1, 768, %s26_s24, [#allocation3], %s4411_s3, %s4411_s3, %s4412_s10  }
  0x25   :  { %s4413_s15 = smov [#allocation7]   ;;  %s4333_s19 = scalar_lea.hbm %s4680_s5, 12288 }
  0x26   :  { %s53_s16 = sshll.u32 %s4413_s15, 4  ;;  %p4334_p2 = scmp.ne.s32.totalorder %s4680_s5, %s4333_s19  ;;  %s54_s16 = int_to_ptr.vmem [resolvable:$true] %s53_s16 }
  0x27   :  { %p4337_p3 = scmp.lt.u32.totalorder %s4333_s19, %s4680_s5 }
  0x29   :  { %p4339_p4 = pnand %p4337_p3, %p4334_p2 }
  0x2b   :  { %4342 = shalt.err (!%p4339_p4)
}
  0x2c   :  { %s4343_s25 = scalar_lea.vmem %s54_s16, 12288  ;;  %p4348_p6 = scmp.lt.s32.totalorder %s54_s16, %s54_s16 }
  0x2d   :  { %p4344_p5 = scmp.ne.s32.totalorder %s54_s16, %s4343_s25  ;;  %p4349_p7 = scmp.lt.s32.totalorder %s4343_s25, %s4343_s25 }
  0x2f   :  { %p4350_p8 = por %p4349_p7, %p4348_p6 }
  0x31   :  { %p4351_p9 = pnand %p4350_p8, %p4344_p5 }
  0x33   :  { %4354 = shalt.err (!%p4351_p9)
}
  0x34   :  { %s4414_s1 = smov 64   ;;  %s4415_s24 = smov 4  }
  0x35   :  { %59 = dma.hbm_to_vmem [thread:$0]  %s4680_s5, 12288, %s54_s16, [#allocation6], %s4414_s1, %s4414_s1, %s4415_s24  }
  0x36   :  { %s4416_s28 = smov [#allocation8]   ;;  %s4355_s12 = scalar_lea.hbm %s4682_s7, 3072 }
  0x37   :  { %s67_s29 = sshll.u32 %s4416_s28, 4  ;;  %p4356_p10 = scmp.ne.s32.totalorder %s4682_s7, %s4355_s12  ;;  %s68_s29 = int_to_ptr.vmem [resolvable:$true] %s67_s29 }
  0x38   :  { %p4359_p11 = scmp.lt.u32.totalorder %s4355_s12, %s4682_s7 }
  0x3a   :  { %p4361_p12 = pnand %p4359_p11, %p4356_p10 }
  0x3c   :  { %4364 = shalt.err (!%p4361_p12)
}
  0x3d   :  { %s4365_s18 = scalar_lea.vmem %s68_s29, 3072  ;;  %p4370_p0 = scmp.lt.s32.totalorder %s68_s29, %s68_s29 }
  0x3e   :  { %p4366_p13 = scmp.ne.s32.totalorder %s68_s29, %s4365_s18  ;;  %p4371_p1 = scmp.lt.s32.totalorder %s4365_s18, %s4365_s18 }
  0x40   :  { %p4372_p2 = por %p4371_p1, %p4370_p0 }
  0x42   :  { %p4373_p3 = pnand %p4372_p2, %p4366_p13 }
  0x44   :  { %4376 = shalt.err (!%p4373_p3)
}
  0x45   :  { %s4417_s5 = smov 192   ;;  %s4418_s16 = smov 12  }
  0x46   :  { %73 = dma.hbm_to_vmem [thread:$0]  %s4682_s7, 3072, %s68_s29, [#allocation9], %s4417_s5, %s4417_s5, %s4418_s16  }
  0x47   :  { %4399 = dma.done.wait [#allocation3], 768  }
  0x48   :  { %4400 = vsyncadd [#allocation3], 4294966528 }
  0x49   :  { %4401 = dma.done.wait [#allocation6], 36864  }
  0x4a   :  { %4402 = vsyncadd [#allocation6], 4294930432 }
  0x4b   :  { %4403 = dma.done.wait [#allocation9], 3072  }
  0x4c   :  { %4404 = vsyncadd [#allocation9], 4294964224  ;;  %v4419_v0 = vmov 0   ;;  %v3812_v1 = vld [vmem:[#allocation2 + $0x4] ss:$24 sps:$4 sm:$0xff]   ;;  %vm132_vm0 = vcmask 130048  }
  0x4d   :  { %168 = vmatprep.mubr.bf16.mxu0 %v4419_v0  ;;  %211 = vmatprep.mubr.bf16.mxu1 %v4419_v0  ;;  %v3814_v2 = vld [vmem:[#allocation2] ss:$24 sps:$4 sm:$0xff]   ;;  %v3816_v4 = vld [vmem:[#allocation2 + $0xc] ss:$24 sps:$4 sm:$0xff]   ;;  %v3819_v6 = vld [vmem:[#allocation2 + $0x10] ss:$24 sps:$4 sm:$0xff]  }
  0x4e   :  { %136 = vmatprep.subr.bf16.mxu0 %v3812_v1  ;;  %v3815_v3 = vld [vmem:[%s4675_s0] sm:$0xff]   ;;  %v3821_v7 = vld [vmem:[#allocation2 + $0x14] ss:$24 sps:$4 sm:$0xff]   ;;  %179 = vmatprep.subr.bf16.mxu1 %v3816_v4  ;;  %v3825_v13 = vld [vmem:[#allocation5 + $0x8] ss:$16 sps:$4 sm:$0xff]   ;;  %vm4422_vm1 = vmmov 0  }
  0x4f   :  { %137 = vmatpush1.bf16.msra.mxu0 %v3814_v2  ;;  %v3818_v5 = vld [vmem:[#allocation2 + $0x8] ss:$24 sps:$4 sm:$0xff]   ;;  %v3824_v9 = vld [vmem:[#allocation5 + $0x4] ss:$16 sps:$4 sm:$0xff]   ;;  %v3827_v10 = vld [vmem:[#allocation5 + $0xc] ss:$16 sps:$4 sm:$0xff]  }
  0x50   :  { %v3822_v8 = vld [vmem:[#allocation5] ss:$16 sps:$4 sm:$0xff]   ;;  %180 = vmatpush1.bf16.msra.mxu1 %v3818_v5  ;;  %222 = vmatprep.subr.bf16.mxu0 %v3821_v7  ;;  %v3830_v11 = vld [vmem:[#allocation5 + $0x24] ss:$16 sps:$4 sm:$0xff]   ;;  %v3833_v15 = vld [vmem:[#allocation5 + $0x2c] ss:$16 sps:$4 sm:$0xff]  }
  0x51   :  { %758 = vmatprep.subr.bf16.mxu1 %v3824_v9  ;;  %v3828_v12 = vld [vmem:[#allocation5 + $0x20] ss:$16 sps:$4 sm:$0xff]   ;;  %v3836_v14 = vld [vmem:[#allocation5 + $0x44] ss:$16 sps:$4 sm:$0xff]   ;;  %v3831_v17 = vld [vmem:[#allocation5 + $0x28] ss:$16 sps:$4 sm:$0xff]  }
  0x52   :  { %3314 = vmatmul.mubr.msk.bf16.vlgmr.msra.gmra.mrb[0].mxu0 %vm132_vm0, %v3815_v3  ;;  %v3834_v16 = vld [vmem:[#allocation5 + $0x40] ss:$16 sps:$4 sm:$0xff]   ;;  %v3842_v18 = vld [vmem:[#allocation5 + $0x64] ss:$16 sps:$4 sm:$0xff]   ;;  %v3839_v19 = vld [vmem:[#allocation5 + $0x4c] ss:$16 sps:$4 sm:$0xff]  }
  0x53   :  { %254 = vmatprep.mubr.bf16.mxu0 %v4419_v0  ;;  %223 = vmatpush1.bf16.msra.mxu0 %v3819_v6  ;;  %v3840_v20 = vld [vmem:[#allocation5 + $0x60] ss:$16 sps:$4 sm:$0xff]   ;;  %v3837_v21 = vld [vmem:[#allocation5 + $0x48] ss:$16 sps:$4 sm:$0xff]   ;;  %v3848_v22 = vld [vmem:[#allocation5 + $0x84] ss:$16 sps:$4 sm:$0xff]  }
  0x54   :  { %3315 = vmatmul.mubr.msk.bf16.vlgmr.msra.gmra.mrb[0].mxu1 %vm132_vm0, %v3815_v3  ;;  %801 = vmatprep.subr.bf16.mxu0 %v3827_v10  ;;  %v3845_v23 = vld [vmem:[#allocation5 + $0x6c] ss:$16 sps:$4 sm:$0xff]   ;;  %v3846_v24 = vld [vmem:[#allocation5 + $0x80] ss:$16 sps:$4 sm:$0xff]   ;;  %v3843_v25 = vld [vmem:[#allocation5 + $0x68] ss:$16 sps:$4 sm:$0xff]  }
  0x55   :  { %759 = vmatpush1.bf16.msra.mxu1 %v3822_v8  ;;  %v3854_v26 = vld [vmem:[#allocation5 + $0xa4] ss:$16 sps:$4 sm:$0xff]   ;;  %v3851_v27 = vld [vmem:[#allocation5 + $0x8c] ss:$16 sps:$4 sm:$0xff]   ;;  %v3852_v28 = vld [vmem:[#allocation5 + $0xa0] ss:$16 sps:$4 sm:$0xff]  }
  0x56   :  { %760 = vmatprep.subr.bf16.mxu1 %v3830_v11  ;;  %v3849_v29 = vld [vmem:[#allocation5 + $0x88] ss:$16 sps:$4 sm:$0xff]   ;;  %v3860_v30 = vld [vmem:[#allocation5 + $0xc4] ss:$16 sps:$4 sm:$0xff]   ;;  %v3857_v31 = vld [vmem:[#allocation5 + $0xac] ss:$16 sps:$4 sm:$0xff]  }
  0x57   :  { %v3858_v32 = vld [vmem:[#allocation5 + $0xc0] ss:$16 sps:$4 sm:$0xff]   ;;  %v3855_v33 = vld [vmem:[#allocation5 + $0xa8] ss:$16 sps:$4 sm:$0xff]   ;;  %v3866_v34 = vld [vmem:[#allocation5 + $0xe4] ss:$16 sps:$4 sm:$0xff]  }
  0x58   :  { %v3863_v35 = vld [vmem:[#allocation5 + $0xcc] ss:$16 sps:$4 sm:$0xff]   ;;  %v3861_v36 = vld [vmem:[#allocation5 + $0xc8] ss:$16 sps:$4 sm:$0xff]   ;;  %v3864_v37 = vld [vmem:[#allocation5 + $0xe0] ss:$16 sps:$4 sm:$0xff]  }
  0x59   :  { %761 = vmatpush1.bf16.msra.mxu1 %v3828_v12  ;;  %v3869_v38 = vld [vmem:[#allocation5 + $0xec] ss:$16 sps:$4 sm:$0xff]   ;;  %v3872_v39 = vld [vmem:[#allocation5 + $0x104] ss:$16 sps:$4 sm:$0xff]   ;;  %v3870_v40 = vld [vmem:[#allocation5 + $0x100] ss:$16 sps:$4 sm:$0xff]  }
  0x5a   :  { %3316 = vmatmul.mubr.msk.bf16.vlgmr.msra.gmra.mrb[4].mxu0 %vm132_vm0, %v3815_v3  ;;  %762 = vmatprep.subr.bf16.mxu1 %v3836_v14  ;;  %v3867_v41 = vld [vmem:[#allocation5 + $0xe8] ss:$16 sps:$4 sm:$0xff]   ;;  %v3878_v42 = vld [vmem:[#allocation5 + $0x124] ss:$16 sps:$4 sm:$0xff]   ;;  %v3875_v43 = vld [vmem:[#allocation5 + $0x10c] ss:$16 sps:$4 sm:$0xff]  }
  0x5b   :  { %802 = vmatpush1.bf16.msra.mxu0 %v3825_v13  ;;  %v3876_v44 = vld [vmem:[#allocation5 + $0x120] ss:$16 sps:$4 sm:$0xff]   ;;  %v3873_v45 = vld [vmem:[#allocation5 + $0x108] ss:$16 sps:$4 sm:$0xff]   ;;  %v3884_v46 = vld [vmem:[#allocation5 + $0x144] ss:$16 sps:$4 sm:$0xff]   ;;  %v277_v13 = vlaneseq }
  0x5c   :  { %803 = vmatprep.subr.bf16.mxu0 %v3833_v15  ;;  %v3881_v47 = vld [vmem:[#allocation5 + $0x12c] ss:$16 sps:$4 sm:$0xff]   ;;  %v3882_v48 = vld [vmem:[#allocation5 + $0x140] ss:$16 sps:$4 sm:$0xff]   ;;  %v3879_v49 = vld [vmem:[#allocation5 + $0x128] ss:$16 sps:$4 sm:$0xff]  }
  0x5d   :  { %763 = vmatpush1.bf16.msra.mxu1 %v3834_v16  ;;  %v3887_v50 = vld [vmem:[#allocation5 + $0x14c] ss:$16 sps:$4 sm:$0xff]   ;;  %v3885_v51 = vld [vmem:[#allocation5 + $0x148] ss:$16 sps:$4 sm:$0xff]   ;;  %v3890_v52 = vld [vmem:[#allocation5 + $0x164] ss:$16 sps:$4 sm:$0xff]  }
  0x5e   :  { %764 = vmatprep.subr.bf16.mxu1 %v3842_v18  ;;  %v3893_v53 = vld [vmem:[#allocation5 + $0x16c] ss:$16 sps:$4 sm:$0xff]   ;;  %v3888_v54 = vld [vmem:[#allocation5 + $0x160] ss:$16 sps:$4 sm:$0xff]   ;;  %v3891_v55 = vld [vmem:[#allocation5 + $0x168] ss:$16 sps:$4 sm:$0xff]  }
  0x5f   :  { %804 = vmatpush1.bf16.msra.mxu0 %v3831_v17  ;;  %v3896_v56 = vld [vmem:[#allocation5 + $0x184] ss:$16 sps:$4 sm:$0xff]   ;;  %v3899_v57 = vld [vmem:[#allocation5 + $0x18c] ss:$16 sps:$4 sm:$0xff]   ;;  %v3894_v58 = vld [vmem:[#allocation5 + $0x180] ss:$16 sps:$4 sm:$0xff]  }
  0x60   :  { %805 = vmatprep.subr.bf16.mxu0 %v3839_v19  ;;  %v3897_v59 = vld [vmem:[#allocation5 + $0x188] ss:$16 sps:$4 sm:$0xff]   ;;  %v3902_v60 = vld [vmem:[#allocation5 + $0x1a4] ss:$16 sps:$4 sm:$0xff]   ;;  %v3905_v61 = vld [vmem:[#allocation5 + $0x1ac] ss:$16 sps:$4 sm:$0xff]  }
  0x61   :  { %765 = vmatpush1.bf16.msra.mxu1 %v3840_v20  ;;  %v3900_v62 = vld [vmem:[#allocation5 + $0x1a0] ss:$16 sps:$4 sm:$0xff]   ;;  %v3903_v63 = vld [vmem:[#allocation5 + $0x1a8] ss:$16 sps:$4 sm:$0xff]   ;;  %v3908_v1 = vld [vmem:[#allocation5 + $0x1c4] ss:$16 sps:$4 sm:$0xff]  }
  0x62   :  { %766 = vmatprep.subr.bf16.mxu1 %v3848_v22  ;;  %v3906_v2 = vld [vmem:[#allocation5 + $0x1c0] ss:$16 sps:$4 sm:$0xff]   ;;  %v3909_v3 = vld [vmem:[#allocation5 + $0x1c8] ss:$16 sps:$4 sm:$0xff]   ;;  %v3911_v4 = vld [vmem:[#allocation5 + $0x1cc] ss:$16 sps:$4 sm:$0xff]  }
  0x63   :  { %806 = vmatpush1.bf16.msra.mxu0 %v3837_v21  ;;  %v3914_v5 = vld [vmem:[#allocation5 + $0x1e4] ss:$16 sps:$4 sm:$0xff]   ;;  %v3917_v6 = vld [vmem:[#allocation5 + $0x1ec] ss:$16 sps:$4 sm:$0xff]   ;;  %v3912_v7 = vld [vmem:[#allocation5 + $0x1e0] ss:$16 sps:$4 sm:$0xff]  }
  0x64   :  { %807 = vmatprep.subr.bf16.mxu0 %v3845_v23  ;;  %v3915_v8 = vld [vmem:[#allocation5 + $0x1e8] ss:$16 sps:$4 sm:$0xff]   ;;  %v3920_v9 = vld [vmem:[#allocation5 + $0x204] ss:$16 sps:$4 sm:$0xff]   ;;  %v3923_v10 = vld [vmem:[#allocation5 + $0x20c] ss:$16 sps:$4 sm:$0xff]  }
  0x65   :  { %767 = vmatpush1.bf16.msra.mxu1 %v3846_v24  ;;  %v4420_v11 = vmov 1966171168   ;;  %v4534_v15 = vshrl.u32 %v277_v13, 7  ;;  %v271_v17 = vld [vmem:[%s4677_s2] sm:$0x3f] }
  0x66   :  { %768 = vmatprep.subr.bf16.mxu1 %v3854_v26  ;;  %v275_v12 = vunpack.c.l.s4 %v4420_v11  ;;  %v273_v22 = vcombine.high %v271_v17, %v271_v17  ;;  %v3944_v11 = vld [vmem:[#allocation5 + $0x284] ss:$16 sps:$4 sm:$0xff]   ;;  %v3942_v13 = vld [vmem:[#allocation5 + $0x280] ss:$16 sps:$4 sm:$0xff]  }
  0x67   :  { %808 = vmatpush1.bf16.msra.mxu0 %v3843_v25  ;;  %v4550_v24 = vsub.s32 0, %v4534_v15 }
  0x68   :  { %809 = vmatprep.subr.bf16.mxu0 %v3851_v27  ;;  %v276_v14 = vunpack.c.0.s8 %v275_v12  ;;  %v3947_v12 = vld [vmem:[#allocation5 + $0x28c] ss:$16 sps:$4 sm:$0xff]  }
  0x69   :  { %769 = vmatpush1.bf16.msra.mxu1 %v3852_v28 }
  0x6a   :  { %770 = vmatprep.subr.bf16.mxu1 %v3860_v30  ;;  %v4537_v16 = vsub.s32 %v276_v14, %v4534_v15  ;;  %v3945_v14 = vld [vmem:[#allocation5 + $0x288] ss:$16 sps:$4 sm:$0xff]  }
  0x6b   :  { %810 = vmatpush1.bf16.msra.mxu0 %v3849_v29 }
  0x6c   :  { %811 = vmatprep.subr.bf16.mxu0 %v3857_v31  ;;  %v280_v18 = vrot.slane %v271_v17, %v4537_v16  ;;  %v4553_v27 = vrot.slane %v273_v22, %v4537_v16  ;;  %v3950_v17 = vld [vmem:[#allocation5 + $0x2a4] ss:$16 sps:$4 sm:$0xff]  }
  0x6d   :  { %771 = vmatpush1.bf16.msra.mxu1 %v3858_v32  ;;  %v3956_v22 = vld [vmem:[#allocation5 + $0x2c4] ss:$16 sps:$4 sm:$0xff]  }
  0x6e   :  { %772 = vmatprep.subr.bf16.mxu1 %v3866_v34  ;;  %v288_v19 = vcombine.high %v280_v18, %v280_v18  ;;  %v4544_v20 = vrot.slane %v280_v18, %v4537_v16  ;;  %v303_v32 = vrot.slane %v4553_v27, %v4537_v16  ;;  %v3953_v18 = vld [vmem:[#allocation5 + $0x2ac] ss:$16 sps:$4 sm:$0xff]  }
  0x6f   :  { %812 = vmatpush1.bf16.msra.mxu0 %v3855_v33 }
  0x70   :  { %813 = vmatprep.subr.bf16.mxu0 %v3863_v35  ;;  %v310_v21 = vrot.slane %v288_v19, %v4537_v16  ;;  %v321_v23 = vpack.i.b16 %v4544_v20, %v4544_v20  ;;  %v3948_v19 = vld [vmem:[#allocation5 + $0x2a0] ss:$16 sps:$4 sm:$0xff]  }
  0x71   :  { %773 = vmatpush1.bf16.msra.mxu1 %v3864_v37 }
  0x72   :  { %774 = vmatprep.subr.bf16.mxu1 %v3872_v39  ;;  %v319_v25 = vcombine.high %v310_v21, %v310_v21  ;;  %v328_v26 = vpack.i.b16 %v310_v21, %v310_v21  ;;  %v326_v30 = vrot.slane %v321_v23, %v4550_v24  ;;  %v3951_v21 = vld [vmem:[#allocation5 + $0x2a8] ss:$16 sps:$4 sm:$0xff]   ;;  %v3959_v23 = vld [vmem:[#allocation5 + $0x2cc] ss:$16 sps:$4 sm:$0xff]  }
  0x73   :  { %814 = vmatpush1.bf16.msra.mxu0 %v3861_v36 }
  0x74   :  { %815 = vmatprep.subr.bf16.mxu0 %v3869_v38  ;;  %v342_v31 = vpack.i.b16 %v319_v25, %v319_v25  ;;  %v333_v34 = vrot.slane %v328_v26, %v4550_v24  ;;  %v3954_v25 = vld [vmem:[#allocation5 + $0x2c0] ss:$16 sps:$4 sm:$0xff]   ;;  %v3957_v26 = vld [vmem:[#allocation5 + $0x2c8] ss:$16 sps:$4 sm:$0xff]  }
  0x75   :  { %775 = vmatpush1.bf16.msra.mxu1 %v3870_v40 }
  0x76   :  { %776 = vmatprep.subr.bf16.mxu1 %v3878_v42  ;;  %v347_v42 = vrot.slane %v342_v31, %v4550_v24  ;;  %v3963_v31 = vld [vmem:[#allocation5 + $0x2e8] ss:$16 sps:$4 sm:$0xff]  }
  0x77   :  { %816 = vmatpush1.bf16.msra.mxu0 %v3867_v41 }
  0x78   :  { %817 = vmatprep.subr.bf16.mxu0 %v3875_v43  ;;  %v349_v43 = vpack.i.b16 %v303_v32, %v303_v32  ;;  %v3968_v32 = vld [vmem:[#allocation5 + $0x304] ss:$16 sps:$4 sm:$0xff]  }
  0x79   :  { %777 = vmatpush1.bf16.msra.mxu1 %v3876_v44 }
  0x7a   :  { %778 = vmatprep.subr.bf16.mxu1 %v3884_v46 }
  0x7b   :  { %818 = vmatpush1.bf16.msra.mxu0 %v3873_v45 }
  0x7c   :  { %819 = vmatprep.subr.bf16.mxu0 %v3881_v47 }
  0x7d   :  { %779 = vmatpush1.bf16.msra.mxu1 %v3882_v48 }
  0x7e   :  { %780 = vmatprep.subr.bf16.mxu1 %v3890_v52 }
  0x7f   :  { %820 = vmatpush1.bf16.msra.mxu0 %v3879_v49 }
  0x80   :  { %821 = vmatprep.subr.bf16.mxu0 %v3887_v50 }
  0x81   :  { %781 = vmatpush1.bf16.msra.mxu1 %v3888_v54 }
  0x82   :  { %782 = vmatprep.subr.bf16.mxu1 %v3896_v56 }
  0x83   :  { %822 = vmatpush1.bf16.msra.mxu0 %v3885_v51  ;;  %v354_v51 = vrot.slane %v349_v43, %v4550_v24  ;;  %v3983_v43 = vld [vmem:[#allocation5 + $0x34c] ss:$16 sps:$4 sm:$0xff]  }
  0x84   :  { %823 = vmatprep.subr.bf16.mxu0 %v3893_v53 }
  0x85   :  { %783 = vmatpush1.bf16.msra.mxu1 %v3894_v58  ;;  %v3921_v58 = vld [vmem:[#allocation5 + $0x208] ss:$16 sps:$4 sm:$0xff]  }
  0x86   :  { %784 = vmatprep.subr.bf16.mxu1 %v3902_v60  ;;  %v3926_v60 = vld [vmem:[#allocation5 + $0x224] ss:$16 sps:$4 sm:$0xff]  }
  0x87   :  { %824 = vmatpush1.bf16.msra.mxu0 %v3891_v55 }
  0x88   :  { %825 = vmatprep.subr.bf16.mxu0 %v3899_v57  ;;  %v3918_v57 = vld [vmem:[#allocation5 + $0x200] ss:$16 sps:$4 sm:$0xff]  }
  0x89   :  { %785 = vmatpush1.bf16.msra.mxu1 %v3900_v62 }
  0x8a   :  { %786 = vmatprep.subr.bf16.mxu1 %v3908_v1  ;;  %v3924_v1 = vld [vmem:[#allocation5 + $0x220] ss:$16 sps:$4 sm:$0xff]  }
  0x8b   :  { %826 = vmatpush1.bf16.msra.mxu0 %v3897_v59 }
  0x8c   :  { %827 = vmatprep.subr.bf16.mxu0 %v3905_v61  ;;  %v3929_v61 = vld [vmem:[#allocation5 + $0x22c] ss:$16 sps:$4 sm:$0xff]  }
  0x8d   :  { %787 = vmatpush1.bf16.msra.mxu1 %v3906_v2  ;;  %v3927_v2 = vld [vmem:[#allocation5 + $0x228] ss:$16 sps:$4 sm:$0xff]  }
  0x8e   :  { %788 = vmatprep.subr.bf16.mxu1 %v3914_v5  ;;  %v3930_v5 = vld [vmem:[#allocation5 + $0x240] ss:$16 sps:$4 sm:$0xff]  }
  0x8f   :  { %828 = vmatpush1.bf16.msra.mxu0 %v3903_v63 }
  0x90   :  { %829 = vmatprep.subr.bf16.mxu0 %v3911_v4  ;;  %v3935_v4 = vld [vmem:[#allocation5 + $0x24c] ss:$16 sps:$4 sm:$0xff]  }
  0x91   :  { %789 = vmatpush1.bf16.msra.mxu1 %v3912_v7  ;;  %v3938_v7 = vld [vmem:[#allocation5 + $0x264] ss:$16 sps:$4 sm:$0xff]  }
  0x92   :  { %1359 = vmatprep.subr.bf16.mxu1 %v3920_v9  ;;  %v3936_v9 = vld [vmem:[#allocation5 + $0x260] ss:$16 sps:$4 sm:$0xff]  }
  0x93   :  { %830 = vmatpush1.bf16.msra.mxu0 %v3909_v3  ;;  %v3932_v3 = vld [vmem:[#allocation5 + $0x244] ss:$16 sps:$4 sm:$0xff]  }
  0x94   :  { %831 = vmatprep.subr.bf16.mxu0 %v3917_v6  ;;  %v3933_v6 = vld [vmem:[#allocation5 + $0x248] ss:$16 sps:$4 sm:$0xff]  }
  0x97   :  { %832 = vmatpush1.bf16.msra.mxu0 %v3915_v8  ;;  %v3941_v8 = vld [vmem:[#allocation5 + $0x26c] ss:$16 sps:$4 sm:$0xff]  }
  0x98   :  { %1402 = vmatprep.subr.bf16.mxu0 %v3923_v10  ;;  %v3939_v10 = vld [vmem:[#allocation5 + $0x268] ss:$16 sps:$4 sm:$0xff]  }
 0x125   :  { %v170_v28 = vpop.f32.mrb[0].mxu0 }
 0x126   :  { %v172_v29 = vpop.f32.mrb[1].mxu0 }
 0x127   :  { %v174_v33 = vpop.f32.mrb[2].mxu0  ;;  %v4559_v37 = vpop.f32.mrb[0].mxu1 }
 0x128   :  { %v265_v35 = vpack.c.bf16 %v174_v33, %v170_v28  ;;  %v176_v36 = vpop.f32.mrb[3].mxu0  ;;  %v215_v39 = vpop.f32.mrb[1].mxu1  ;;  %v3962_v28 = vld [vmem:[#allocation5 + $0x2e4] ss:$16 sps:$4 sm:$0xff]   ;;  %v3971_v33 = vld [vmem:[#allocation5 + $0x30c] ss:$16 sps:$4 sm:$0xff]  }
 0x129   :  { %v266_v38 = vpack.c.bf16 %v176_v36, %v172_v29  ;;  %v4561_v41 = vpop.f32.mrb[2].mxu1  ;;  %v3965_v29 = vld [vmem:[#allocation5 + $0x2ec] ss:$16 sps:$4 sm:$0xff]   ;;  %v3974_v36 = vld [vmem:[#allocation5 + $0x324] ss:$16 sps:$4 sm:$0xff]  }
 0x12a   :  { %v362_v40 = vadd.bf16 %v326_v30, %v265_v35  ;;  %v267_v45 = vpack.c.bf16 %v4561_v41, %v4559_v37  ;;  %v219_v46 = vpop.f32.mrb[3].mxu1  ;;  %v3960_v30 = vld [vmem:[#allocation5 + $0x2e0] ss:$16 sps:$4 sm:$0xff]   ;;  %v3969_v35 = vld [vmem:[#allocation5 + $0x308] ss:$16 sps:$4 sm:$0xff]  }
 0x12b   :  { %v363_v44 = vadd.bf16 %v333_v34, %v266_v38  ;;  %v268_v47 = vpack.c.bf16 %v219_v46, %v215_v39  ;;  %v3966_v34 = vld [vmem:[#allocation5 + $0x300] ss:$16 sps:$4 sm:$0xff]   ;;  %v3977_v38 = vld [vmem:[#allocation5 + $0x32c] ss:$16 sps:$4 sm:$0xff]   ;;  %v4011_v41 = vld [vmem:[#allocation5 + $0x3e8] ss:$16 sps:$4 sm:$0xff]  }
 0x12c   :  { %v3972_v39 = vld [vmem:[#allocation5 + $0x320] ss:$16 sps:$4 sm:$0xff]  }
 0x12d   :  { %4239 = vtanh.bf16 %v363_v44  ;;  %v256_v48 = vpop.f32.mrb[4].mxu0  ;;  %v365_v49 = vadd.bf16 %v347_v42, %v268_v47  ;;  %v3980_v42 = vld [vmem:[#allocation5 + $0x344] ss:$16 sps:$4 sm:$0xff]   ;;  %v318_v44 = vcombine.high %v4544_v20, %v4544_v20  ;;  %v3978_v46 = vld [vmem:[#allocation5 + $0x340] ss:$16 sps:$4 sm:$0xff]  }
 0x12e   :  { %4241 = vtanh.bf16 %v362_v40  ;;  %v4566_v50 = vpop.f32.mrb[5].mxu0  ;;  %v3975_v40 = vld [vmem:[#allocation5 + $0x328] ss:$16 sps:$4 sm:$0xff]   ;;  %v3990_v20 = vld [vmem:[#allocation5 + $0x380] ss:$16 sps:$4 sm:$0xff]  }
 0x12f   :  { %v260_v52 = vpop.f32.mrb[6].mxu0  ;;  %4243 = vtanh.bf16 %v365_v49  ;;  %v3981_v47 = vld [vmem:[#allocation5 + $0x348] ss:$16 sps:$4 sm:$0xff]   ;;  %v3989_v49 = vld [vmem:[#allocation5 + $0x36c] ss:$16 sps:$4 sm:$0xff]  }
 0x130   :  { %v269_v53 = vpack.c.bf16 %v260_v52, %v256_v48  ;;  %v4569_v54 = vpop.f32.mrb[7].mxu0  ;;  %v3986_v48 = vld [vmem:[#allocation5 + $0x364] ss:$16 sps:$4 sm:$0xff]   ;;  %v3984_v52 = vld [vmem:[#allocation5 + $0x360] ss:$16 sps:$4 sm:$0xff]  }
 0x131   :  { %v270_v55 = vpack.c.bf16 %v4569_v54, %v4566_v50  ;;  %v4008_v37 = vld [vmem:[#allocation5 + $0x3e0] ss:$16 sps:$4 sm:$0xff]   ;;  %v4077_v50 = vld [vmem:[#allocation7 + $0x38] sm:$0xff]  }
 0x132   :  { %v4573_v56 = vadd.bf16 %v354_v51, %v269_v53  ;;  %v335_v51 = vpack.i.b16 %v318_v44, %v318_v44  ;;  %v3987_v53 = vld [vmem:[#allocation5 + $0x368] ss:$16 sps:$4 sm:$0xff]  }
 0x133   :  { %v4043_v44 = vld [vmem:[#allocation7 + $0x178] sm:$0xff]  }
 0x134   :  { %v4078_v54 = vld [vmem:[#allocation7 + $0xb8] sm:$0xff]  }
 0x138   :  { %v4240_v59 = vpop.eup %4239 }
 0x139   :  { %v4242_v62 = vpop.eup %4241  ;;  %790 = vmatprep.mubr.bf16.mxu1 %v4240_v59  ;;  %833 = vmatprep.mubr.bf16.mxu0 %v4240_v59  ;;  %v340_v59 = vrot.slane %v335_v51, %v4550_v24  ;;  %v4048_v51 = vld [vmem:[#allocation7 + $0xc0] sm:$0xff]  }
 0x13a   :  { %791 = vmatmul.mubr.bf16.vlgmr.msra.gmra.mrb[4].mxu1 %v4242_v62  ;;  %834 = vmatmul.mubr.bf16.vlgmr.msra.gmra.mrb[8].mxu0 %v4242_v62  ;;  %v4244_v63 = vpop.eup %4243  ;;  %v4001_v62 = vld [vmem:[#allocation5 + $0x3ac] ss:$16 sps:$4 sm:$0xff]  }
 0x13b   :  { %1360 = vmatpush1.bf16.msra.mxu1 %v3918_v57  ;;  %1403 = vmatpush1.bf16.msra.mxu0 %v3921_v58  ;;  %v3992_v57 = vld [vmem:[#allocation5 + $0x384] ss:$16 sps:$4 sm:$0xff]   ;;  %v3995_v58 = vld [vmem:[#allocation5 + $0x38c] ss:$16 sps:$4 sm:$0xff]  }
 0x13c   :  { %1361 = vmatprep.subr.bf16.mxu1 %v3926_v60  ;;  %1404 = vmatprep.subr.bf16.mxu0 %v3929_v61  ;;  %v3993_v60 = vld [vmem:[#allocation5 + $0x388] ss:$16 sps:$4 sm:$0xff]   ;;  %v3998_v61 = vld [vmem:[#allocation5 + $0x3a4] ss:$16 sps:$4 sm:$0xff]  }
 0x13d   :  { %1391 = vmatprep.mubr.bf16.mxu1 %v4244_v63  ;;  %1434 = vmatprep.mubr.bf16.mxu0 %v4244_v63  ;;  %v364_v63 = vadd.bf16 %v340_v59, %v267_v45 }
 0x13f   :  { %1362 = vmatpush1.bf16.msra.mxu1 %v3924_v1  ;;  %1405 = vmatpush1.bf16.msra.mxu0 %v3927_v2  ;;  %v3996_v1 = vld [vmem:[#allocation5 + $0x3a0] ss:$16 sps:$4 sm:$0xff]   ;;  %v3999_v2 = vld [vmem:[#allocation5 + $0x3a8] ss:$16 sps:$4 sm:$0xff]   ;;  %4245 = vtanh.bf16 %v364_v63 }
 0x140   :  { %1363 = vmatprep.subr.bf16.mxu1 %v3932_v3  ;;  %1406 = vmatprep.subr.bf16.mxu0 %v3935_v4  ;;  %v4004_v3 = vld [vmem:[#allocation5 + $0x3c4] ss:$16 sps:$4 sm:$0xff]   ;;  %v4007_v4 = vld [vmem:[#allocation5 + $0x3cc] ss:$16 sps:$4 sm:$0xff]  }
 0x143   :  { %1364 = vmatpush1.bf16.msra.mxu1 %v3930_v5  ;;  %1407 = vmatpush1.bf16.msra.mxu0 %v3933_v6  ;;  %v4002_v5 = vld [vmem:[#allocation5 + $0x3c0] ss:$16 sps:$4 sm:$0xff]   ;;  %v4005_v6 = vld [vmem:[#allocation5 + $0x3c8] ss:$16 sps:$4 sm:$0xff]  }
 0x144   :  { %1365 = vmatprep.subr.bf16.mxu1 %v3938_v7  ;;  %1408 = vmatprep.subr.bf16.mxu0 %v3941_v8  ;;  %v4010_v7 = vld [vmem:[#allocation5 + $0x3e4] ss:$16 sps:$4 sm:$0xff]   ;;  %v4013_v8 = vld [vmem:[#allocation5 + $0x3ec] ss:$16 sps:$4 sm:$0xff]  }
 0x147   :  { %1366 = vmatpush1.bf16.msra.mxu1 %v3936_v9  ;;  %1409 = vmatpush1.bf16.msra.mxu0 %v3939_v10  ;;  %v4015_v9 = vld [vmem:[#allocation7 + $0x140] sm:$0xff]  }
 0x148   :  { %1367 = vmatprep.subr.bf16.mxu1 %v3944_v11  ;;  %1410 = vmatprep.subr.bf16.mxu0 %v3947_v12  ;;  %v4016_v10 = vld [vmem:[#allocation7 + $0x1c0] sm:$0xff]  }
 0x149   :  { %v4017_v11 = vld [vmem:[#allocation7 + $0x100] sm:$0xff]  }
 0x14a   :  { %v4246_v45 = vpop.eup %4245  ;;  %v4018_v12 = vld [vmem:[#allocation7 + $0x180] sm:$0xff]  }
 0x14b   :  { %1368 = vmatpush1.bf16.msra.mxu1 %v3942_v13  ;;  %1411 = vmatpush1.bf16.msra.mxu0 %v3945_v14  ;;  %v4019_v13 = vld [vmem:[#allocation7 + $0x148] sm:$0xff]  }
 0x14c   :  { %1369 = vmatprep.subr.bf16.mxu1 %v3950_v17  ;;  %1412 = vmatprep.subr.bf16.mxu0 %v3953_v18  ;;  %v4020_v14 = vld [vmem:[#allocation7 + $0x1c8] sm:$0xff]  }
 0x14d   :  { %v4021_v17 = vld [vmem:[#allocation7 + $0x108] sm:$0xff]  }
 0x14e   :  { %v4022_v18 = vld [vmem:[#allocation7 + $0x188] sm:$0xff]  }
 0x14f   :  { %1370 = vmatpush1.bf16.msra.mxu1 %v3948_v19  ;;  %1413 = vmatpush1.bf16.msra.mxu0 %v3951_v21  ;;  %v4023_v19 = vld [vmem:[#allocation7 + $0x150] sm:$0xff]  }
 0x150   :  { %1371 = vmatprep.subr.bf16.mxu1 %v3956_v22  ;;  %1414 = vmatprep.subr.bf16.mxu0 %v3959_v23  ;;  %v4024_v21 = vld [vmem:[#allocation7 + $0x1d0] sm:$0xff]  }
 0x151   :  { %v4025_v22 = vld [vmem:[#allocation7 + $0x110] sm:$0xff]  }
 0x152   :  { %v4026_v23 = vld [vmem:[#allocation7 + $0x190] sm:$0xff]  }
 0x153   :  { %1372 = vmatpush1.bf16.msra.mxu1 %v3954_v25  ;;  %1415 = vmatpush1.bf16.msra.mxu0 %v3957_v26  ;;  %v4027_v25 = vld [vmem:[#allocation7 + $0x158] sm:$0xff]  }
 0x154   :  { %1373 = vmatprep.subr.bf16.mxu1 %v3962_v28  ;;  %1416 = vmatprep.subr.bf16.mxu0 %v3965_v29  ;;  %v4028_v26 = vld [vmem:[#allocation7 + $0x1d8] sm:$0xff]  }
 0x155   :  { %v4029_v28 = vld [vmem:[#allocation7 + $0x118] sm:$0xff]  }
 0x156   :  { %v4030_v29 = vld [vmem:[#allocation7 + $0x198] sm:$0xff]  }
 0x157   :  { %1374 = vmatpush1.bf16.msra.mxu1 %v3960_v30  ;;  %1417 = vmatpush1.bf16.msra.mxu0 %v3963_v31  ;;  %v4031_v30 = vld [vmem:[#allocation7 + $0x160] sm:$0xff]  }
 0x158   :  { %1375 = vmatprep.subr.bf16.mxu1 %v3968_v32  ;;  %1418 = vmatprep.subr.bf16.mxu0 %v3971_v33  ;;  %v4032_v31 = vld [vmem:[#allocation7 + $0x1e0] sm:$0xff]  }
 0x159   :  { %v4033_v32 = vld [vmem:[#allocation7 + $0x120] sm:$0xff]  }
 0x15a   :  { %v4034_v33 = vld [vmem:[#allocation7 + $0x1a0] sm:$0xff]  }
 0x15b   :  { %1376 = vmatpush1.bf16.msra.mxu1 %v3966_v34  ;;  %1419 = vmatpush1.bf16.msra.mxu0 %v3969_v35  ;;  %v4035_v34 = vld [vmem:[#allocation7 + $0x168] sm:$0xff]  }
 0x15c   :  { %1377 = vmatprep.subr.bf16.mxu1 %v3974_v36  ;;  %1420 = vmatprep.subr.bf16.mxu0 %v3977_v38  ;;  %v4036_v35 = vld [vmem:[#allocation7 + $0x1e8] sm:$0xff]  }
 0x15d   :  { %v4037_v36 = vld [vmem:[#allocation7 + $0x128] sm:$0xff]  }
 0x15e   :  { %v4038_v38 = vld [vmem:[#allocation7 + $0x1a8] sm:$0xff]  }
 0x15f   :  { %1378 = vmatpush1.bf16.msra.mxu1 %v3972_v39  ;;  %1421 = vmatpush1.bf16.msra.mxu0 %v3975_v40  ;;  %v4039_v39 = vld [vmem:[#allocation7 + $0x170] sm:$0xff]  }
 0x160   :  { %1379 = vmatprep.subr.bf16.mxu1 %v3980_v42  ;;  %1422 = vmatprep.subr.bf16.mxu0 %v3983_v43  ;;  %v4040_v40 = vld [vmem:[#allocation7 + $0x1f0] sm:$0xff]  }
 0x161   :  { %v4041_v42 = vld [vmem:[#allocation7 + $0x130] sm:$0xff]  }
 0x162   :  { %v4042_v43 = vld [vmem:[#allocation7 + $0x1b0] sm:$0xff]  }
 0x163   :  { %1380 = vmatpush1.bf16.msra.mxu1 %v3978_v46  ;;  %1423 = vmatpush1.bf16.msra.mxu0 %v3981_v47  ;;  %v4044_v46 = vld [vmem:[#allocation7 + $0x1f8] sm:$0xff]  }
 0x164   :  { %1381 = vmatprep.subr.bf16.mxu1 %v3986_v48  ;;  %1424 = vmatprep.subr.bf16.mxu0 %v3989_v49  ;;  %v4045_v47 = vld [vmem:[#allocation7 + $0x138] sm:$0xff]   ;;  %v4047_v49 = vld [vmem:[#allocation7 + $0x40] sm:$0xff]  }
 0x165   :  { %v4046_v48 = vld [vmem:[#allocation7 + $0x1b8] sm:$0xff]  }
 0x167   :  { %1382 = vmatpush1.bf16.msra.mxu1 %v3984_v52  ;;  %1425 = vmatpush1.bf16.msra.mxu0 %v3987_v53 }
 0x168   :  { %1383 = vmatprep.subr.bf16.mxu1 %v3992_v57  ;;  %1426 = vmatprep.subr.bf16.mxu0 %v3995_v58 }
 0x16b   :  { %1384 = vmatpush1.bf16.msra.mxu1 %v3990_v20  ;;  %1427 = vmatpush1.bf16.msra.mxu0 %v3993_v60 }
 0x16c   :  { %1385 = vmatprep.subr.bf16.mxu1 %v3998_v61  ;;  %1428 = vmatprep.subr.bf16.mxu0 %v4001_v62 }
 0x16f   :  { %1386 = vmatpush1.bf16.msra.mxu1 %v3996_v1  ;;  %1429 = vmatpush1.bf16.msra.mxu0 %v3999_v2 }
 0x170   :  { %1387 = vmatprep.subr.bf16.mxu1 %v4004_v3  ;;  %1430 = vmatprep.subr.bf16.mxu0 %v4007_v4  ;;  %v3447_v3 = vld.sshfl [vmem:[%s4679_s4 + $0x4] sm:$0x33 pattern:$0x75316420] }
 0x171   :  { %v3381_v4 = vld.sshfl [vmem:[%s4679_s4] sm:$0x33 pattern:$0x75316420] }
 0x173   :  { %1388 = vmatpush1.bf16.msra.mxu1 %v4002_v5  ;;  %1431 = vmatpush1.bf16.msra.mxu0 %v4005_v6  ;;  %v1459_v5 = vcombine.high %v3447_v3, %v3447_v3  ;;  %v857_v6 = vcombine.high %v3381_v4, %v3381_v4 }
 0x174   :  { %1389 = vmatprep.subr.bf16.mxu1 %v4010_v7  ;;  %1432 = vmatprep.subr.bf16.mxu0 %v4013_v8  ;;  %v1466_v8 = vrot.slane %v3447_v3, %v4537_v16  ;;  %v4052_v3 = vld [vmem:[#allocation7 + $0xc8] sm:$0xff]  }
 0x175   :  { %v1473_v7 = vrot.slane %v1459_v5, %v4537_v16 }
 0x177   :  { %1390 = vmatpush1.bf16.msra.mxu1 %v4008_v37  ;;  %1433 = vmatpush1.bf16.msra.mxu0 %v4011_v41  ;;  %v871_v37 = vrot.slane %v857_v6, %v4537_v16  ;;  %v1475_v41 = vcombine.high %v1473_v7, %v1473_v7 }
 0x178   :  { %3634 = vmatprep.subr.bf16.mxu1 %v4015_v9  ;;  %3656 = vmatprep.subr.bf16.mxu0 %v4016_v10  ;;  %v1477_v10 = vpack.i.b16 %v1466_v8, %v1466_v8 }
 0x179   :  { %v873_v9 = vcombine.high %v871_v37, %v871_v37 }
 0x17a   :  { %1392 = vmatmul.mubr.bf16.vlgmr.msra.gmra.mrb[8].mxu1 %v4246_v45  ;;  %1435 = vmatmul.mubr.bf16.vlgmr.msra.gmra.mrb[12].mxu0 %v4246_v45  ;;  %v1474_v45 = vcombine.high %v1466_v8, %v1466_v8  ;;  %v4054_v8 = vld [vmem:[#allocation7 + $0x88] sm:$0xff]  }
 0x17b   :  { %3635 = vmatpush3.bf16.msra.mxu1 %v4017_v11  ;;  %3657 = vmatpush3.bf16.msra.mxu0 %v4018_v12  ;;  %v1484_v11 = vpack.i.b16 %v1473_v7, %v1473_v7  ;;  %v1498_v12 = vpack.i.b16 %v1475_v41, %v1475_v41  ;;  %v289_v7 = vcombine.high %v4553_v27, %v4553_v27  ;;  %v4056_v41 = vld [vmem:[#allocation7 + $0xd0] sm:$0xff]  }
 0x17c   :  { %3636 = vmatprep.subr.bf16.mxu1 %v4019_v13  ;;  %3658 = vmatprep.subr.bf16.mxu0 %v4020_v14  ;;  %v1491_v13 = vpack.i.b16 %v1474_v45, %v1474_v45  ;;  %v882_v14 = vpack.i.b16 %v871_v37, %v871_v37  ;;  %v4055_v37 = vld [vmem:[#allocation7 + $0x50] sm:$0xff]  }
 0x17f   :  { %3637 = vmatpush3.bf16.msra.mxu1 %v4021_v17  ;;  %3659 = vmatpush3.bf16.msra.mxu0 %v4022_v18 }
 0x180   :  { %3638 = vmatprep.subr.bf16.mxu1 %v4023_v19  ;;  %3660 = vmatprep.subr.bf16.mxu0 %v4024_v21  ;;  %v896_v19 = vpack.i.b16 %v873_v9, %v873_v9  ;;  %v4057_v9 = vld [vmem:[#allocation7 + $0x10] sm:$0xff]  }
 0x183   :  { %3639 = vmatpush3.bf16.msra.mxu1 %v4025_v22  ;;  %3661 = vmatpush3.bf16.msra.mxu0 %v4026_v23  ;;  %v1482_v23 = vrot.slane %v1477_v10, %v4550_v24  ;;  %v4058_v10 = vld [vmem:[#allocation7 + $0x90] sm:$0xff]  }
 0x184   :  { %3640 = vmatprep.subr.bf16.mxu1 %v4027_v25  ;;  %3662 = vmatprep.subr.bf16.mxu0 %v4028_v26 }
 0x187   :  { %3641 = vmatpush3.bf16.msra.mxu1 %v4029_v28  ;;  %3663 = vmatpush3.bf16.msra.mxu0 %v4030_v29  ;;  %v1489_v28 = vrot.slane %v1484_v11, %v4550_v24  ;;  %v1503_v29 = vrot.slane %v1498_v12, %v4550_v24  ;;  %v4059_v11 = vld [vmem:[#allocation7 + $0x58] sm:$0xff]  }
 0x188   :  { %3642 = vmatprep.subr.bf16.mxu1 %v4031_v30  ;;  %3664 = vmatprep.subr.bf16.mxu0 %v4032_v31  ;;  %v4060_v12 = vld [vmem:[#allocation7 + $0xd8] sm:$0xff]  }
 0x18b   :  { %3643 = vmatpush3.bf16.msra.mxu1 %v4033_v32  ;;  %3665 = vmatpush3.bf16.msra.mxu0 %v4034_v33  ;;  %v1496_v32 = vrot.slane %v1491_v13, %v4550_v24 }
 0x18c   :  { %3644 = vmatprep.subr.bf16.mxu1 %v4035_v34  ;;  %3666 = vmatprep.subr.bf16.mxu0 %v4036_v35  ;;  %v887_v35 = vrot.slane %v882_v14, %v4550_v24  ;;  %v4061_v14 = vld [vmem:[#allocation7 + $0x18] sm:$0xff]  }
 0x18f   :  { %3645 = vmatpush3.bf16.msra.mxu1 %v4037_v36  ;;  %3667 = vmatpush3.bf16.msra.mxu0 %v4038_v38 }
 0x190   :  { %3646 = vmatprep.subr.bf16.mxu1 %v4039_v39  ;;  %3668 = vmatprep.subr.bf16.mxu0 %v4040_v40  ;;  %v901_v39 = vrot.slane %v896_v19, %v4550_v24  ;;  %v4063_v19 = vld [vmem:[#allocation7 + $0x60] sm:$0xff]  }
 0x193   :  { %3647 = vmatpush3.bf16.msra.mxu1 %v4041_v42  ;;  %3669 = vmatpush3.bf16.msra.mxu0 %v4042_v43 }
 0x194   :  { %3648 = vmatprep.subr.bf16.mxu1 %v4043_v44  ;;  %3670 = vmatprep.subr.bf16.mxu0 %v4044_v46 }
 0x197   :  { %3649 = vmatpush3.bf16.msra.mxu1 %v4045_v47  ;;  %3671 = vmatpush3.bf16.msra.mxu0 %v4046_v48 }
 0x198   :  { %3678 = vmatprep.subr.bf16.mxu1 %v4047_v49  ;;  %3700 = vmatprep.subr.bf16.mxu0 %v4048_v51  ;;  %v4049_v49 = vld [vmem:[#allocation7] sm:$0xff]  }
 0x20d   :  { %v4581_v52 = vpop.f32.mrb[4].mxu1  ;;  %v4583_v53 = vpop.f32.mrb[8].mxu0 }
 0x20e   :  { %v794_v57 = vpop.f32.mrb[5].mxu1  ;;  %v837_v58 = vpop.f32.mrb[9].mxu0 }
 0x20f   :  { %v4585_v59 = vpop.f32.mrb[6].mxu1  ;;  %v4587_v20 = vpop.f32.mrb[10].mxu0 }
 0x210   :  { %v844_v60 = vpack.c.bf16 %v4585_v59, %v4581_v52  ;;  %v846_v61 = vpack.c.bf16 %v4587_v20, %v4583_v53  ;;  %v798_v62 = vpop.f32.mrb[7].mxu1  ;;  %v841_v63 = vpop.f32.mrb[11].mxu0  ;;  %v4073_v52 = vld [vmem:[#allocation7 + $0x30] sm:$0xff]   ;;  %v4075_v59 = vld [vmem:[#allocation7 + $0x78] sm:$0xff]  }
 0x211   :  { %v845_v1 = vpack.c.bf16 %v798_v62, %v794_v57  ;;  %v847_v2 = vpack.c.bf16 %v841_v63, %v837_v58  ;;  %v4050_v57 = vld [vmem:[#allocation7 + $0x80] sm:$0xff]   ;;  %v4051_v62 = vld [vmem:[#allocation7 + $0x48] sm:$0xff]   ;;  %v4074_v53 = vld [vmem:[#allocation7 + $0xb0] sm:$0xff]  }
 0x212   :  { %v4076_v20 = vld [vmem:[#allocation7 + $0xf8] sm:$0xff]  }
 0x213   :  { %v903_v46 = vadd.bf16 %v887_v35, %v845_v1  ;;  %v905_v47 = vadd.bf16 %v901_v39, %v847_v2  ;;  %v864_v1 = vrot.slane %v3381_v4, %v4537_v16  ;;  %v4053_v2 = vld [vmem:[#allocation7 + $0x8] sm:$0xff]   ;;  %v317_v4 = vrot.slane %v289_v7, %v4537_v16 }
 0x214   :  { %v4070_v35 = vld [vmem:[#allocation7 + $0xa8] sm:$0xff]  }
 0x215   :  { %v872_v45 = vcombine.high %v864_v1, %v864_v1  ;;  %v875_v27 = vpack.i.b16 %v864_v1, %v864_v1  ;;  %v4082_v39 = vld [vmem:[#allocation5 + $0x408] ss:$16 sps:$4 sm:$0xff]   ;;  %v4105_v1 = vld [vmem:[#allocation5 + $0x484] ss:$16 sps:$4 sm:$0xff]  }
 0x216   :  { %v4106_v7 = vld [vmem:[#allocation5 + $0x488] ss:$16 sps:$4 sm:$0xff]  }
 0x217   :  { %v889_v13 = vpack.i.b16 %v872_v45, %v872_v45  ;;  %v4112_v45 = vld [vmem:[#allocation5 + $0x4a8] ss:$16 sps:$4 sm:$0xff]  }
 0x24d   :  { %v1393_v17 = vpop.f32.mrb[8].mxu1  ;;  %v1436_v18 = vpop.f32.mrb[12].mxu0 }
 0x24e   :  { %v1395_v21 = vpop.f32.mrb[9].mxu1  ;;  %v1438_v22 = vpop.f32.mrb[13].mxu0 }
 0x24f   :  { %v1397_v25 = vpop.f32.mrb[10].mxu1  ;;  %v1440_v26 = vpop.f32.mrb[14].mxu0 }
 0x250   :  { %v1445_v30 = vpack.c.bf16 %v1397_v25, %v1393_v17  ;;  %v1447_v31 = vpack.c.bf16 %v1440_v26, %v1436_v18  ;;  %v1399_v33 = vpop.f32.mrb[11].mxu1  ;;  %v1442_v34 = vpop.f32.mrb[15].mxu0  ;;  %v356_v17 = vpack.i.b16 %v317_v4, %v317_v4  ;;  %v4062_v18 = vld [vmem:[#allocation7 + $0x98] sm:$0xff]   ;;  %v4065_v25 = vld [vmem:[#allocation7 + $0x20] sm:$0xff]  }
 0x251   :  { %v1446_v36 = vpack.c.bf16 %v1399_v33, %v1395_v21  ;;  %v1448_v38 = vpack.c.bf16 %v1442_v34, %v1438_v22  ;;  %v4064_v21 = vld [vmem:[#allocation7 + $0xe0] sm:$0xff]   ;;  %v880_v22 = vrot.slane %v875_v27, %v4550_v24  ;;  %v4069_v33 = vld [vmem:[#allocation7 + $0x28] sm:$0xff]  }
 0x252   :  { %v1504_v40 = vadd.bf16 %v1482_v23, %v1445_v30  ;;  %v1506_v44 = vadd.bf16 %v1496_v32, %v1447_v31  ;;  %v894_v23 = vrot.slane %v889_v13, %v4550_v24  ;;  %v361_v26 = vrot.slane %v356_v17, %v4550_v24  ;;  %v4068_v30 = vld [vmem:[#allocation7 + $0xe8] sm:$0xff]   ;;  %v4121_v13 = vld [vmem:[#allocation5 + $0x4e0] ss:$16 sps:$4 sm:$0xff]   ;;  %v4129_v17 = vld [vmem:[#allocation5 + $0x504] ss:$16 sps:$4 sm:$0xff]  }
 0x253   :  { %v1505_v42 = vadd.bf16 %v1489_v28, %v1446_v36  ;;  %v1507_v43 = vadd.bf16 %v1503_v29, %v1448_v38  ;;  %v4066_v28 = vld [vmem:[#allocation7 + $0xa0] sm:$0xff]   ;;  %v4067_v29 = vld [vmem:[#allocation7 + $0x68] sm:$0xff]   ;;  %v902_v31 = vadd.bf16 %v880_v22, %v844_v60  ;;  %v4071_v36 = vld [vmem:[#allocation7 + $0x70] sm:$0xff]  }
 0x254   :  { %4247 = vtanh.bf16 %v1504_v40  ;;  %v904_v32 = vadd.bf16 %v894_v23, %v846_v61  ;;  %v367_v34 = vadd.bf16 %v361_v26, %v270_v55  ;;  %v4072_v38 = vld [vmem:[#allocation7 + $0xf0] sm:$0xff]   ;;  %v4084_v60 = vld [vmem:[#allocation5 + $0x40c] ss:$16 sps:$4 sm:$0xff]   ;;  %v4136_v26 = vld [vmem:[#allocation5 + $0x528] ss:$16 sps:$4 sm:$0xff]  }
 0x255   :  { %4249 = vtanh.bf16 %v1505_v42  ;;  %v4081_v55 = vld [vmem:[#allocation5 + $0x404] ss:$16 sps:$4 sm:$0xff]   ;;  %v4079_v61 = vld [vmem:[#allocation5 + $0x400] ss:$16 sps:$4 sm:$0xff]   ;;  %v4120_v4 = vld [vmem:[#allocation5 + $0x4cc] ss:$16 sps:$4 sm:$0xff]  }
 0x256   :  { %4251 = vtanh.bf16 %v1507_v43  ;;  %v4087_v42 = vld [vmem:[#allocation5 + $0x424] ss:$16 sps:$4 sm:$0xff]   ;;  %v4126_v27 = vld [vmem:[#allocation5 + $0x4ec] ss:$16 sps:$4 sm:$0xff]  }
 0x257   :  { %4253 = vtanh.bf16 %v1506_v44  ;;  %v4090_v44 = vld [vmem:[#allocation5 + $0x42c] ss:$16 sps:$4 sm:$0xff]   ;;  %v4135_v22 = vld [vmem:[#allocation5 + $0x524] ss:$16 sps:$4 sm:$0xff]  }
 0x258   :  { %4255 = vtanh.bf16 %v903_v46  ;;  %v4138_v23 = vld [vmem:[#allocation5 + $0x52c] ss:$16 sps:$4 sm:$0xff]  }
 0x259   :  { %4257 = vtanh.bf16 %v905_v47  ;;  %v4085_v47 = vld [vmem:[#allocation5 + $0x420] ss:$16 sps:$4 sm:$0xff]  }
 0x25a   :  { %4259 = vtanh.bf16 %v902_v31  ;;  %v4142_v31 = vld [vmem:[#allocation5 + $0x548] ss:$16 sps:$4 sm:$0xff]  }
 0x25b   :  { %4261 = vtanh.bf16 %v904_v32  ;;  %v4147_v32 = vld [vmem:[#allocation5 + $0x564] ss:$16 sps:$4 sm:$0xff]  }
 0x25c   :  { %4263 = vtanh.bf16 %v367_v34  ;;  %v4145_v34 = vld [vmem:[#allocation5 + $0x560] ss:$16 sps:$4 sm:$0xff]  }
 0x25d   :  { %4265 = vtanh.bf16 %v4573_v56  ;;  %v4175_v56 = vld [vmem:[#allocation7 + $0x240] sm:$0xff]  }
 0x25f   :  { %v4248_v48 = vpop.eup %4247 }
 0x260   :  { %v4250_v51 = vpop.eup %4249 }
 0x261   :  { %v4252_v58 = vpop.eup %4251  ;;  %1801 = vmatprep.mubr.bf16.mxu1 %v4250_v51  ;;  %v4096_v51 = vld [vmem:[#allocation5 + $0x44c] ss:$16 sps:$4 sm:$0xff]  }
 0x262   :  { %v4254_v63 = vpop.eup %4253  ;;  %1842 = vmatprep.mubr.bf16.mxu0 %v4252_v58  ;;  %1802 = vmatmul.mubr.bf16.vlgmr.msra.gmra.mrb[12].mxu1 %v4248_v48  ;;  %v4088_v48 = vld [vmem:[#allocation5 + $0x428] ss:$16 sps:$4 sm:$0xff]  }
 0x263   :  { %v4256_v5 = vpop.eup %4255  ;;  %1843 = vmatmul.mubr.bf16.vlgmr.msra.gmra.mrb[16].mxu0 %v4254_v63  ;;  %3679 = vmatpush3.bf16.msra.mxu1 %v4049_v49  ;;  %v4093_v49 = vld [vmem:[#allocation5 + $0x444] ss:$16 sps:$4 sm:$0xff]   ;;  %v4094_v58 = vld [vmem:[#allocation5 + $0x448] ss:$16 sps:$4 sm:$0xff]   ;;  %v4102_v63 = vld [vmem:[#allocation5 + $0x46c] ss:$16 sps:$4 sm:$0xff]  }
 0x264   :  { %v4258_v6 = vpop.eup %4257  ;;  %3701 = vmatpush3.bf16.msra.mxu0 %v4050_v57  ;;  %2075 = vmatprep.mubr.bf16.mxu1 %v4256_v5  ;;  %v4091_v57 = vld [vmem:[#allocation5 + $0x440] ss:$16 sps:$4 sm:$0xff]   ;;  %v4100_v5 = vld [vmem:[#allocation5 + $0x468] ss:$16 sps:$4 sm:$0xff]  }
 0x265   :  { %2116 = vmatprep.mubr.bf16.mxu0 %v4258_v6  ;;  %3680 = vmatprep.subr.bf16.mxu1 %v4051_v62  ;;  %v4260_v40 = vpop.eup %4259  ;;  %v4099_v62 = vld [vmem:[#allocation5 + $0x464] ss:$16 sps:$4 sm:$0xff]   ;;  %v4103_v6 = vld [vmem:[#allocation5 + $0x480] ss:$16 sps:$4 sm:$0xff]  }
 0x266   :  { %3702 = vmatprep.subr.bf16.mxu0 %v4052_v3  ;;  %v4262_v43 = vpop.eup %4261  ;;  %v4097_v3 = vld [vmem:[#allocation5 + $0x460] ss:$16 sps:$4 sm:$0xff]  }
 0x267   :  { %3681 = vmatpush3.bf16.msra.mxu1 %v4053_v2  ;;  %v4264_v46 = vpop.eup %4263  ;;  %v4108_v2 = vld [vmem:[#allocation5 + $0x48c] ss:$16 sps:$4 sm:$0xff]  }
 0x268   :  { %3703 = vmatpush3.bf16.msra.mxu0 %v4054_v8  ;;  %3682 = vmatprep.subr.bf16.mxu1 %v4055_v37  ;;  %v4111_v8 = vld [vmem:[#allocation5 + $0x4a4] ss:$16 sps:$4 sm:$0xff]   ;;  %v4114_v37 = vld [vmem:[#allocation5 + $0x4ac] ss:$16 sps:$4 sm:$0xff]  }
 0x269   :  { %3704 = vmatprep.subr.bf16.mxu0 %v4056_v41  ;;  %v4109_v41 = vld [vmem:[#allocation5 + $0x4a0] ss:$16 sps:$4 sm:$0xff]  }
 0x26b   :  { %3683 = vmatpush3.bf16.msra.mxu1 %v4057_v9  ;;  %v4117_v9 = vld [vmem:[#allocation5 + $0x4c4] ss:$16 sps:$4 sm:$0xff]  }
 0x26c   :  { %3705 = vmatpush3.bf16.msra.mxu0 %v4058_v10  ;;  %3684 = vmatprep.subr.bf16.mxu1 %v4059_v11  ;;  %v4115_v10 = vld [vmem:[#allocation5 + $0x4c0] ss:$16 sps:$4 sm:$0xff]   ;;  %v4118_v11 = vld [vmem:[#allocation5 + $0x4c8] ss:$16 sps:$4 sm:$0xff]  }
 0x26d   :  { %3706 = vmatprep.subr.bf16.mxu0 %v4060_v12  ;;  %v4123_v12 = vld [vmem:[#allocation5 + $0x4e4] ss:$16 sps:$4 sm:$0xff]  }
 0x26f   :  { %3685 = vmatpush3.bf16.msra.mxu1 %v4061_v14  ;;  %v4124_v14 = vld [vmem:[#allocation5 + $0x4e8] ss:$16 sps:$4 sm:$0xff]  }
 0x270   :  { %3707 = vmatpush3.bf16.msra.mxu0 %v4062_v18  ;;  %3686 = vmatprep.subr.bf16.mxu1 %v4063_v19  ;;  %v4132_v18 = vld [vmem:[#allocation5 + $0x50c] ss:$16 sps:$4 sm:$0xff]   ;;  %v4127_v19 = vld [vmem:[#allocation5 + $0x500] ss:$16 sps:$4 sm:$0xff]  }
 0x271   :  { %3708 = vmatprep.subr.bf16.mxu0 %v4064_v21  ;;  %v4130_v21 = vld [vmem:[#allocation5 + $0x508] ss:$16 sps:$4 sm:$0xff]  }
 0x273   :  { %3687 = vmatpush3.bf16.msra.mxu1 %v4065_v25  ;;  %v4133_v25 = vld [vmem:[#allocation5 + $0x520] ss:$16 sps:$4 sm:$0xff]  }
 0x274   :  { %3709 = vmatpush3.bf16.msra.mxu0 %v4066_v28  ;;  %3688 = vmatprep.subr.bf16.mxu1 %v4067_v29  ;;  %v4141_v28 = vld [vmem:[#allocation5 + $0x544] ss:$16 sps:$4 sm:$0xff]   ;;  %v4144_v29 = vld [vmem:[#allocation5 + $0x54c] ss:$16 sps:$4 sm:$0xff]  }
 0x275   :  { %3710 = vmatprep.subr.bf16.mxu0 %v4068_v30  ;;  %v4139_v30 = vld [vmem:[#allocation5 + $0x540] ss:$16 sps:$4 sm:$0xff]  }
 0x277   :  { %3689 = vmatpush3.bf16.msra.mxu1 %v4069_v33  ;;  %v4150_v33 = vld [vmem:[#allocation5 + $0x56c] ss:$16 sps:$4 sm:$0xff]  }
 0x278   :  { %3711 = vmatpush3.bf16.msra.mxu0 %v4070_v35  ;;  %3690 = vmatprep.subr.bf16.mxu1 %v4071_v36  ;;  %v4148_v35 = vld [vmem:[#allocation5 + $0x568] ss:$16 sps:$4 sm:$0xff]   ;;  %v4153_v36 = vld [vmem:[#allocation5 + $0x584] ss:$16 sps:$4 sm:$0xff]  }
 0x279   :  { %3712 = vmatprep.subr.bf16.mxu0 %v4072_v38  ;;  %v4156_v38 = vld [vmem:[#allocation5 + $0x58c] ss:$16 sps:$4 sm:$0xff]  }
 0x27b   :  { %3691 = vmatpush3.bf16.msra.mxu1 %v4073_v52  ;;  %v4151_v52 = vld [vmem:[#allocation5 + $0x580] ss:$16 sps:$4 sm:$0xff]  }
 0x27c   :  { %3713 = vmatpush3.bf16.msra.mxu0 %v4074_v53  ;;  %3692 = vmatprep.subr.bf16.mxu1 %v4075_v59  ;;  %v4154_v53 = vld [vmem:[#allocation5 + $0x588] ss:$16 sps:$4 sm:$0xff]   ;;  %v4159_v59 = vld [vmem:[#allocation5 + $0x5a4] ss:$16 sps:$4 sm:$0xff]  }
 0x27d   :  { %3714 = vmatprep.subr.bf16.mxu0 %v4076_v20  ;;  %v4162_v20 = vld [vmem:[#allocation5 + $0x5ac] ss:$16 sps:$4 sm:$0xff]  }
 0x27f   :  { %3693 = vmatpush3.bf16.msra.mxu1 %v4077_v50  ;;  %v4157_v50 = vld [vmem:[#allocation5 + $0x5a0] ss:$16 sps:$4 sm:$0xff]  }
 0x280   :  { %3715 = vmatpush3.bf16.msra.mxu0 %v4078_v54  ;;  %2510 = vmatprep.subr.bf16.mxu1 %v4081_v55  ;;  %v4160_v54 = vld [vmem:[#allocation5 + $0x5a8] ss:$16 sps:$4 sm:$0xff]   ;;  %v4165_v55 = vld [vmem:[#allocation5 + $0x5c4] ss:$16 sps:$4 sm:$0xff]  }
 0x281   :  { %2553 = vmatprep.subr.bf16.mxu0 %v4084_v60  ;;  %v4168_v60 = vld [vmem:[#allocation5 + $0x5cc] ss:$16 sps:$4 sm:$0xff]  }
 0x282   :  { %2076 = vmatmul.mubr.bf16.vlgmr.msra.gmra.mrb[16].mxu1 %v4260_v40  ;;  %v4171_v40 = vld [vmem:[#allocation5 + $0x5e4] ss:$16 sps:$4 sm:$0xff]  }
 0x283   :  { %2117 = vmatmul.mubr.bf16.vlgmr.msra.gmra.mrb[20].mxu0 %v4262_v43  ;;  %2511 = vmatpush1.bf16.msra.mxu1 %v4079_v61  ;;  %v4163_v61 = vld [vmem:[#allocation5 + $0x5c0] ss:$16 sps:$4 sm:$0xff]  }
 0x284   :  { %2542 = vmatprep.mubr.bf16.mxu1 %v4264_v46  ;;  %2554 = vmatpush1.bf16.msra.mxu0 %v4082_v39  ;;  %v4166_v39 = vld [vmem:[#allocation5 + $0x5c8] ss:$16 sps:$4 sm:$0xff]   ;;  %v4169_v43 = vld [vmem:[#allocation5 + $0x5e0] ss:$16 sps:$4 sm:$0xff]  }
 0x285   :  { %2585 = vmatprep.mubr.bf16.mxu0 %v4264_v46  ;;  %2512 = vmatprep.subr.bf16.mxu1 %v4087_v42  ;;  %v4174_v42 = vld [vmem:[#allocation5 + $0x5ec] ss:$16 sps:$4 sm:$0xff]   ;;  %v4266_v46 = vpop.eup %4265 }
 0x286   :  { %2555 = vmatprep.subr.bf16.mxu0 %v4090_v44  ;;  %v4172_v44 = vld [vmem:[#allocation5 + $0x5e8] ss:$16 sps:$4 sm:$0xff]  }
 0x287   :  { %2513 = vmatpush1.bf16.msra.mxu1 %v4085_v47  ;;  %v4176_v47 = vld [vmem:[#allocation7 + $0x2c0] sm:$0xff]  }
 0x288   :  { %2556 = vmatpush1.bf16.msra.mxu0 %v4088_v48  ;;  %2514 = vmatprep.subr.bf16.mxu1 %v4093_v49  ;;  %v4177_v48 = vld [vmem:[#allocation7 + $0x200] sm:$0xff]  }
 0x289   :  { %2557 = vmatprep.subr.bf16.mxu0 %v4096_v51  ;;  %v4178_v49 = vld [vmem:[#allocation7 + $0x280] sm:$0xff]   ;;  %v4179_v51 = vld [vmem:[#allocation7 + $0x248] sm:$0xff]  }
 0x28b   :  { %2515 = vmatpush1.bf16.msra.mxu1 %v4091_v57  ;;  %v4180_v57 = vld [vmem:[#allocation7 + $0x2c8] sm:$0xff]  }
 0x28c   :  { %2558 = vmatpush1.bf16.msra.mxu0 %v4094_v58  ;;  %2516 = vmatprep.subr.bf16.mxu1 %v4099_v62  ;;  %v4181_v58 = vld [vmem:[#allocation7 + $0x208] sm:$0xff]  }
 0x28d   :  { %2559 = vmatprep.subr.bf16.mxu0 %v4102_v63  ;;  %v4182_v62 = vld [vmem:[#allocation7 + $0x288] sm:$0xff]   ;;  %v4183_v63 = vld [vmem:[#allocation7 + $0x250] sm:$0xff]  }
 0x28f   :  { %2517 = vmatpush1.bf16.msra.mxu1 %v4097_v3  ;;  %v4184_v3 = vld [vmem:[#allocation7 + $0x2d0] sm:$0xff]  }
 0x290   :  { %2560 = vmatpush1.bf16.msra.mxu0 %v4100_v5  ;;  %2518 = vmatprep.subr.bf16.mxu1 %v4105_v1  ;;  %v4185_v5 = vld [vmem:[#allocation7 + $0x210] sm:$0xff]  }
 0x291   :  { %2561 = vmatprep.subr.bf16.mxu0 %v4108_v2  ;;  %v4186_v1 = vld [vmem:[#allocation7 + $0x290] sm:$0xff]   ;;  %v4187_v2 = vld [vmem:[#allocation7 + $0x258] sm:$0xff]  }
 0x293   :  { %2519 = vmatpush1.bf16.msra.mxu1 %v4103_v6  ;;  %v4188_v6 = vld [vmem:[#allocation7 + $0x2d8] sm:$0xff]  }
 0x294   :  { %2562 = vmatpush1.bf16.msra.mxu0 %v4106_v7  ;;  %2520 = vmatprep.subr.bf16.mxu1 %v4111_v8  ;;  %v4189_v7 = vld [vmem:[#allocation7 + $0x218] sm:$0xff]  }
 0x295   :  { %2563 = vmatprep.subr.bf16.mxu0 %v4114_v37  ;;  %v4190_v8 = vld [vmem:[#allocation7 + $0x298] sm:$0xff]   ;;  %v4191_v37 = vld [vmem:[#allocation7 + $0x260] sm:$0xff]  }
 0x297   :  { %2521 = vmatpush1.bf16.msra.mxu1 %v4109_v41  ;;  %v4192_v41 = vld [vmem:[#allocation7 + $0x2e0] sm:$0xff]  }
 0x298   :  { %2564 = vmatpush1.bf16.msra.mxu0 %v4112_v45  ;;  %2522 = vmatprep.subr.bf16.mxu1 %v4117_v9  ;;  %v4193_v45 = vld [vmem:[#allocation7 + $0x220] sm:$0xff]  }
 0x299   :  { %2565 = vmatprep.subr.bf16.mxu0 %v4120_v4  ;;  %v4194_v9 = vld [vmem:[#allocation7 + $0x2a0] sm:$0xff]   ;;  %v4195_v4 = vld [vmem:[#allocation7 + $0x268] sm:$0xff]  }
 0x29b   :  { %2523 = vmatpush1.bf16.msra.mxu1 %v4115_v10  ;;  %v4196_v10 = vld [vmem:[#allocation7 + $0x2e8] sm:$0xff]  }
 0x29c   :  { %2566 = vmatpush1.bf16.msra.mxu0 %v4118_v11  ;;  %2524 = vmatprep.subr.bf16.mxu1 %v4123_v12  ;;  %v4197_v11 = vld [vmem:[#allocation7 + $0x228] sm:$0xff]  }
 0x29d   :  { %2567 = vmatprep.subr.bf16.mxu0 %v4126_v27  ;;  %v4198_v12 = vld [vmem:[#allocation7 + $0x2a8] sm:$0xff]   ;;  %v4199_v27 = vld [vmem:[#allocation7 + $0x270] sm:$0xff]  }
 0x29f   :  { %2525 = vmatpush1.bf16.msra.mxu1 %v4121_v13  ;;  %v4200_v13 = vld [vmem:[#allocation7 + $0x2f0] sm:$0xff]  }
 0x2a0   :  { %2568 = vmatpush1.bf16.msra.mxu0 %v4124_v14  ;;  %2526 = vmatprep.subr.bf16.mxu1 %v4129_v17  ;;  %v4201_v14 = vld [vmem:[#allocation7 + $0x230] sm:$0xff]  }
 0x2a1   :  { %2569 = vmatprep.subr.bf16.mxu0 %v4132_v18  ;;  %v4202_v17 = vld [vmem:[#allocation7 + $0x2b0] sm:$0xff]   ;;  %v4203_v18 = vld [vmem:[#allocation7 + $0x278] sm:$0xff]  }
 0x2a3   :  { %2527 = vmatpush1.bf16.msra.mxu1 %v4127_v19  ;;  %v4204_v19 = vld [vmem:[#allocation7 + $0x2f8] sm:$0xff]  }
 0x2a4   :  { %2570 = vmatpush1.bf16.msra.mxu0 %v4130_v21  ;;  %2528 = vmatprep.subr.bf16.mxu1 %v4135_v22  ;;  %v4205_v21 = vld [vmem:[#allocation7 + $0x238] sm:$0xff]  }
 0x2a5   :  { %2571 = vmatprep.subr.bf16.mxu0 %v4138_v23  ;;  %v4206_v22 = vld [vmem:[#allocation7 + $0x2b8] sm:$0xff]   ;;  %v4209_v23 = vld [vmem:[#allocation8 + $0x4] ss:$12 sps:$4 sm:$0xff]  }
 0x2a7   :  { %2529 = vmatpush1.bf16.msra.mxu1 %v4133_v25  ;;  %v4421_v25 = vmov 0.0  }
 0x2a8   :  { %2572 = vmatpush1.bf16.msra.mxu0 %v4136_v26  ;;  %2530 = vmatprep.subr.bf16.mxu1 %v4141_v28 }
 0x2a9   :  { %2573 = vmatprep.subr.bf16.mxu0 %v4144_v29 }
 0x2ab   :  { %2531 = vmatpush1.bf16.msra.mxu1 %v4139_v30 }
 0x2ac   :  { %2574 = vmatpush1.bf16.msra.mxu0 %v4142_v31  ;;  %2532 = vmatprep.subr.bf16.mxu1 %v4147_v32 }
 0x2ad   :  { %2575 = vmatprep.subr.bf16.mxu0 %v4150_v33 }
 0x2af   :  { %2533 = vmatpush1.bf16.msra.mxu1 %v4145_v34 }
 0x2b0   :  { %2576 = vmatpush1.bf16.msra.mxu0 %v4148_v35  ;;  %2534 = vmatprep.subr.bf16.mxu1 %v4153_v36 }
 0x2b1   :  { %2577 = vmatprep.subr.bf16.mxu0 %v4156_v38 }
 0x2b3   :  { %2535 = vmatpush1.bf16.msra.mxu1 %v4151_v52 }
 0x2b4   :  { %2578 = vmatpush1.bf16.msra.mxu0 %v4154_v53  ;;  %2536 = vmatprep.subr.bf16.mxu1 %v4159_v59 }
 0x2b5   :  { %2579 = vmatprep.subr.bf16.mxu0 %v4162_v20 }
 0x2b7   :  { %2537 = vmatpush1.bf16.msra.mxu1 %v4157_v50 }
 0x2b8   :  { %2580 = vmatpush1.bf16.msra.mxu0 %v4160_v54  ;;  %2538 = vmatprep.subr.bf16.mxu1 %v4165_v55 }
 0x2b9   :  { %2581 = vmatprep.subr.bf16.mxu0 %v4168_v60 }
 0x2bb   :  { %2539 = vmatpush1.bf16.msra.mxu1 %v4163_v61 }
 0x2bc   :  { %2582 = vmatpush1.bf16.msra.mxu0 %v4166_v39  ;;  %2540 = vmatprep.subr.bf16.mxu1 %v4171_v40 }
 0x2bd   :  { %2583 = vmatprep.subr.bf16.mxu0 %v4174_v42 }
 0x2bf   :  { %2541 = vmatpush1.bf16.msra.mxu1 %v4169_v43 }
 0x2c0   :  { %2584 = vmatpush1.bf16.msra.mxu0 %v4172_v44  ;;  %3722 = vmatprep.subr.bf16.mxu1 %v4175_v56 }
 0x2c1   :  { %3744 = vmatprep.subr.bf16.mxu0 %v4176_v47 }
 0x2c2   :  { %2543 = vmatmul.mubr.bf16.vlgmr.msra.gmra.mrb[20].mxu1 %v4266_v46 }
 0x2c3   :  { %2586 = vmatmul.mubr.bf16.vlgmr.msra.gmra.mrb[24].mxu0 %v4266_v46  ;;  %3723 = vmatpush3.bf16.msra.mxu1 %v4177_v48 }
 0x2c4   :  { %3745 = vmatpush3.bf16.msra.mxu0 %v4178_v49  ;;  %3724 = vmatprep.subr.bf16.mxu1 %v4179_v51  ;;  %v3577_v51 = vld.sshfl [vmem:[%s4679_s4 + $0x8] sm:$0x33 pattern:$0x75316420] }
 0x2c5   :  { %3746 = vmatprep.subr.bf16.mxu0 %v4180_v57  ;;  %v2610_v57 = vcombine.high %v3577_v51, %v3577_v51 }
 0x2c7   :  { %3725 = vmatpush3.bf16.msra.mxu1 %v4181_v58  ;;  %v2617_v58 = vrot.slane %v3577_v51, %v4537_v16 }
 0x2c8   :  { %3747 = vmatpush3.bf16.msra.mxu0 %v4182_v62  ;;  %3726 = vmatprep.subr.bf16.mxu1 %v4183_v63  ;;  %v2624_v62 = vrot.slane %v2610_v57, %v4537_v16 }
 0x2c9   :  { %3748 = vmatprep.subr.bf16.mxu0 %v4184_v3  ;;  %v2625_v63 = vcombine.high %v2617_v58, %v2617_v58 }
 0x2ca   :  { %v2626_v3 = vcombine.high %v2624_v62, %v2624_v62 }
 0x2cb   :  { %3727 = vmatpush3.bf16.msra.mxu1 %v4185_v5  ;;  %v2628_v5 = vpack.i.b16 %v2617_v58, %v2617_v58 }
 0x2cc   :  { %3749 = vmatpush3.bf16.msra.mxu0 %v4186_v1  ;;  %3728 = vmatprep.subr.bf16.mxu1 %v4187_v2  ;;  %v2635_v1 = vpack.i.b16 %v2624_v62, %v2624_v62  ;;  %v2642_v2 = vpack.i.b16 %v2625_v63, %v2625_v63  ;;  %v3005_v63 = vld [vmem:[%s4681_s6] sm:$0x1] }
 0x2cd   :  { %3750 = vmatprep.subr.bf16.mxu0 %v4188_v6  ;;  %v2649_v6 = vpack.i.b16 %v2626_v3, %v2626_v3 }
 0x2cf   :  { %3729 = vmatpush3.bf16.msra.mxu1 %v4189_v7 }
 0x2d0   :  { %3751 = vmatpush3.bf16.msra.mxu0 %v4190_v8  ;;  %3730 = vmatprep.subr.bf16.mxu1 %v4191_v37 }
 0x2d1   :  { %3752 = vmatprep.subr.bf16.mxu0 %v4192_v41  ;;  %v2633_v41 = vrot.slane %v2628_v5, %v4550_v24 }
 0x2d3   :  { %3731 = vmatpush3.bf16.msra.mxu1 %v4193_v45 }
 0x2d4   :  { %3753 = vmatpush3.bf16.msra.mxu0 %v4194_v9  ;;  %3732 = vmatprep.subr.bf16.mxu1 %v4195_v4  ;;  %v2640_v4 = vrot.slane %v2635_v1, %v4550_v24 }
 0x2d5   :  { %3754 = vmatprep.subr.bf16.mxu0 %v4196_v10 }
 0x2d7   :  { %3733 = vmatpush3.bf16.msra.mxu1 %v4197_v11 }
 0x2d8   :  { %3755 = vmatpush3.bf16.msra.mxu0 %v4198_v12  ;;  %3734 = vmatprep.subr.bf16.mxu1 %v4199_v27  ;;  %v2647_v12 = vrot.slane %v2642_v2, %v4550_v24  ;;  %v2654_v27 = vrot.slane %v2649_v6, %v4550_v24 }
 0x2d9   :  { %3756 = vmatprep.subr.bf16.mxu0 %v4200_v13 }
 0x2db   :  { %3735 = vmatpush3.bf16.msra.mxu1 %v4201_v14 }
 0x2dc   :  { %3757 = vmatpush3.bf16.msra.mxu0 %v4202_v17  ;;  %3736 = vmatprep.subr.bf16.mxu1 %v4203_v18 }
 0x2dd   :  { %3758 = vmatprep.subr.bf16.mxu0 %v4204_v19 }
 0x2df   :  { %3737 = vmatpush3.bf16.msra.mxu1 %v4205_v21 }
 0x2e0   :  { %3759 = vmatpush3.bf16.msra.mxu0 %v4206_v22  ;;  %3192 = vmatprep.subr.bf16.mxu1 %v4209_v23 }
 0x2e1   :  { %3775 = vmatprep.subr.bf16.mxu0 %v4421_v25 }
 0x335   :  { %v3650_v26 = vpop.f32.mrb[12].mxu1 }
 0x336   :  { %v3672_v28 = vpop.f32.mrb[16].mxu0  ;;  %v3651_v29 = vpop.f32.mrb[13].mxu1 }
 0x337   :  { %v3652_v30 = vadd.f32 %v3651_v29, %v3650_v26  ;;  %v3673_v31 = vpop.f32.mrb[17].mxu0  ;;  %v3653_v32 = vpop.f32.mrb[14].mxu1 }
 0x338   :  { %v3674_v33 = vadd.f32 %v3673_v31, %v3672_v28  ;;  %v3675_v34 = vpop.f32.mrb[18].mxu0  ;;  %v3654_v35 = vpop.f32.mrb[15].mxu1  ;;  %v4207_v28 = vld [vmem:[#allocation8] ss:$12 sps:$4 sm:$0xff]   ;;  %v4213_v31 = vld [vmem:[#allocation8 + $0x1c] ss:$12 sps:$4 sm:$0xff]  }
 0x339   :  { %v3655_v36 = vadd.f32 %v3654_v35, %v3653_v32  ;;  %v3676_v38 = vpop.f32.mrb[19].mxu0  ;;  %v4214_v35 = vld [vmem:[#allocation8 + $0x20] ss:$12 sps:$4 sm:$0xff]  }
 0x33a   :  { %v1845_v52 = vadd.f32 %v3674_v33, %v3652_v30  ;;  %v3677_v53 = vadd.f32 %v3676_v38, %v3675_v34  ;;  %v4210_v30 = vld [vmem:[#allocation8 + $0x8] ss:$12 sps:$4 sm:$0xff]   ;;  %v4211_v34 = vld [vmem:[#allocation8 + $0x18] ss:$12 sps:$4 sm:$0xff]   ;;  %v4215_v38 = vld [vmem:[#allocation8 + $0x30] ss:$12 sps:$4 sm:$0xff]  }
 0x33c   :  { %v1848_v59 = vadd.f32 %v3677_v53, %v3655_v36  ;;  %v4217_v36 = vld [vmem:[#allocation8 + $0x34] ss:$12 sps:$4 sm:$0xff]   ;;  %v4221_v53 = vld [vmem:[#allocation8 + $0x4c] ss:$12 sps:$4 sm:$0xff]  }
 0x355   :  { %v3694_v20 = vpop.f32.mrb[16].mxu1 }
 0x356   :  { %v3716_v50 = vpop.f32.mrb[20].mxu0  ;;  %v3695_v54 = vpop.f32.mrb[17].mxu1 }
 0x357   :  { %v3696_v55 = vadd.f32 %v3695_v54, %v3694_v20  ;;  %v3717_v60 = vpop.f32.mrb[21].mxu0  ;;  %v3697_v61 = vpop.f32.mrb[18].mxu1  ;;  %v4222_v20 = vld [vmem:[#allocation8 + $0x50] ss:$12 sps:$4 sm:$0xff]   ;;  %v4226_v54 = vld [vmem:[#allocation8 + $0x68] ss:$12 sps:$4 sm:$0xff]  }
 0x358   :  { %v3718_v39 = vadd.f32 %v3717_v60, %v3716_v50  ;;  %v3719_v40 = vpop.f32.mrb[22].mxu0  ;;  %v3698_v42 = vpop.f32.mrb[19].mxu1  ;;  %v4225_v50 = vld [vmem:[#allocation8 + $0x64] ss:$12 sps:$4 sm:$0xff]  }
 0x359   :  { %v2078_v43 = vadd.f32 %v3696_v55, %v1845_v52  ;;  %v3699_v44 = vadd.f32 %v3698_v42, %v3697_v61  ;;  %v3720_v46 = vpop.f32.mrb[23].mxu0  ;;  %v4218_v52 = vld [vmem:[#allocation8 + $0x38] ss:$12 sps:$4 sm:$0xff]   ;;  %v4229_v55 = vld [vmem:[#allocation8 + $0x7c] ss:$12 sps:$4 sm:$0xff]  }
 0x35a   :  { %v3721_v56 = vadd.f32 %v3720_v46, %v3719_v40  ;;  %v4227_v60 = vld [vmem:[#allocation8 + $0x78] ss:$12 sps:$4 sm:$0xff]   ;;  %v4230_v61 = vld [vmem:[#allocation8 + $0x80] ss:$12 sps:$4 sm:$0xff]   ;;  %v4231_v40 = vld [vmem:[#allocation8 + $0x90] ss:$12 sps:$4 sm:$0xff]  }
 0x35b   :  { %v4626_v47 = vadd.f32 %v3718_v39, %v2078_v43  ;;  %v2081_v48 = vadd.f32 %v3699_v44, %v1848_v59  ;;  %v4219_v59 = vld [vmem:[#allocation8 + $0x48] ss:$12 sps:$4 sm:$0xff]   ;;  %v4234_v42 = vld [vmem:[#allocation8 + $0x98] ss:$12 sps:$4 sm:$0xff]   ;;  %v4238_v46 = vld [vmem:[#allocation8 + $0xb0] ss:$12 sps:$4 sm:$0xff]  }
 0x35c   :  { %v4233_v39 = vld [vmem:[#allocation8 + $0x94] ss:$12 sps:$4 sm:$0xff]   ;;  %v4237_v43 = vld [vmem:[#allocation8 + $0xac] ss:$12 sps:$4 sm:$0xff]  }
 0x35d   :  { %v4628_v49 = vadd.f32 %v3721_v56, %v2081_v48  ;;  %v4235_v44 = vld [vmem:[#allocation8 + $0xa8] ss:$12 sps:$4 sm:$0xff]  }
 0x395   :  { %v2544_v7 = vpop.f32.mrb[20].mxu1 }
 0x396   :  { %v2587_v8 = vpop.f32.mrb[24].mxu0  ;;  %v2546_v37 = vpop.f32.mrb[21].mxu1 }
 0x397   :  { %v2589_v45 = vpop.f32.mrb[25].mxu0  ;;  %v2548_v9 = vpop.f32.mrb[22].mxu1 }
 0x398   :  { %v2596_v10 = vpack.c.bf16 %v2548_v9, %v2544_v7  ;;  %v2591_v11 = vpop.f32.mrb[26].mxu0  ;;  %v2550_v16 = vpop.f32.mrb[23].mxu1 }
 0x399   :  { %v2598_v13 = vpack.c.bf16 %v2591_v11, %v2587_v8  ;;  %v2597_v14 = vpack.c.bf16 %v2550_v16, %v2546_v37  ;;  %v2593_v17 = vpop.f32.mrb[27].mxu0  ;;  %v3047_v16 = vld [vmem:[%s4683_s8] sm:$0x7]  ;;  %s4423_s8 = smov [#allocation10]  }
 0x39a   :  { %v2655_v18 = vadd.bf16 %v2633_v41, %v2596_v10  ;;  %v2599_v19 = vpack.c.bf16 %v2593_v17, %v2589_v45  ;;  %s3293_s29 = sshll.u32 %s4423_s8, 4  ;;  %s3294_s29 = int_to_ptr.vmem [resolvable:$true] %s3293_s29 }
 0x39b   :  { %v2656_v21 = vadd.bf16 %v2640_v4, %v2597_v14  ;;  %v2657_v22 = vadd.bf16 %v2647_v12, %v2598_v13  ;;  %v3059_v12 = vsub.s32 2, %v4534_v15  ;;  %s4377_s30 = scalar_lea.vmem %s3294_s29, 768  ;;  %p4382_p5 = scmp.lt.s32.totalorder %s3294_s29, %s3294_s29 }
 0x39c   :  { %v2658_v23 = vadd.bf16 %v2654_v27, %v2599_v19  ;;  %4267 = vtanh.bf16 %v2655_v18  ;;  %v3055_v27 = vsub.s32 1, %v4534_v15  ;;  %p4378_p4 = scmp.ne.s32.totalorder %s3294_s29, %s4377_s30  ;;  %p4383_p6 = scmp.lt.s32.totalorder %s4377_s30, %s4377_s30 }
 0x39d   :  { %4269 = vtanh.bf16 %v2656_v21  ;;  %v3060_v13 = vrot.slane %v3047_v16, %v3059_v12 }
 0x39e   :  { %4271 = vtanh.bf16 %v2658_v23  ;;  %p4384_p7 = por %p4383_p6, %p4382_p5 }
 0x39f   :  { %4273 = vtanh.bf16 %v2657_v22 }
 0x3a0   :  { %p4385_p8 = pnand %p4384_p7, %p4378_p4 }
 0x3a7   :  { %v4268_v26 = vpop.eup %4267 }
 0x3a8   :  { %v4270_v29 = vpop.eup %4269 }
 0x3a9   :  { %v4272_v32 = vpop.eup %4271  ;;  %2952 = vmatprep.mubr.bf16.mxu1 %v4270_v29 }
 0x3aa   :  { %v4274_v33 = vpop.eup %4273  ;;  %2993 = vmatprep.mubr.bf16.mxu0 %v4272_v32  ;;  %2953 = vmatmul.mubr.bf16.vlgmr.msra.gmra.mrb[24].mxu1 %v4268_v26 }
 0x3ab   :  { %2994 = vmatmul.mubr.bf16.vlgmr.msra.gmra.mrb[28].mxu0 %v4274_v33  ;;  %3193 = vmatpush1.bf16.msra.mxu1 %v4207_v28 }
 0x3ac   :  { %3776 = vmatpush3.bf16.msra.mxu0 %v4210_v30  ;;  %3194 = vmatprep.subr.bf16.mxu1 %v4213_v31 }
 0x3ad   :  { %3777 = vmatprep.subr.bf16.mxu0 %v4421_v25  ;;  %3224 = vmatprep.mubr.bf16.mxu1 %v4419_v0  ;;  %v4223_v0 = vld [vmem:[#allocation8 + $0x60] ss:$12 sps:$4 sm:$0xff]  }
 0x3ae   :  { %3791 = vmatprep.mubr.msk.bf16.mxu0 %vm4422_vm1, %v4421_v25 }
 0x3af   :  { %3195 = vmatpush1.bf16.msra.mxu1 %v4211_v34 }
 0x3b0   :  { %3778 = vmatpush3.bf16.msra.mxu0 %v4214_v35  ;;  %3196 = vmatprep.subr.bf16.mxu1 %v4217_v36 }
 0x3b1   :  { %3779 = vmatprep.subr.bf16.mxu0 %v4421_v25 }
 0x3b3   :  { %3197 = vmatpush1.bf16.msra.mxu1 %v4215_v38 }
 0x3b4   :  { %3780 = vmatpush3.bf16.msra.mxu0 %v4218_v52  ;;  %3198 = vmatprep.subr.bf16.mxu1 %v4221_v53 }
 0x3b5   :  { %3781 = vmatprep.subr.bf16.mxu0 %v4421_v25 }
 0x3b7   :  { %3199 = vmatpush1.bf16.msra.mxu1 %v4219_v59 }
 0x3b8   :  { %3782 = vmatpush3.bf16.msra.mxu0 %v4222_v20  ;;  %3200 = vmatprep.subr.bf16.mxu1 %v4225_v50 }
 0x3b9   :  { %3783 = vmatprep.subr.bf16.mxu0 %v4421_v25 }
 0x3bb   :  { %3201 = vmatpush1.bf16.msra.mxu1 %v4223_v0 }
 0x3bc   :  { %3784 = vmatpush3.bf16.msra.mxu0 %v4226_v54  ;;  %3202 = vmatprep.subr.bf16.mxu1 %v4229_v55 }
 0x3bd   :  { %3785 = vmatprep.subr.bf16.mxu0 %v4421_v25 }
 0x3bf   :  { %3203 = vmatpush1.bf16.msra.mxu1 %v4227_v60 }
 0x3c0   :  { %3786 = vmatpush3.bf16.msra.mxu0 %v4230_v61  ;;  %3204 = vmatprep.subr.bf16.mxu1 %v4233_v39 }
 0x3c1   :  { %3787 = vmatprep.subr.bf16.mxu0 %v4421_v25 }
 0x3c3   :  { %3205 = vmatpush1.bf16.msra.mxu1 %v4231_v40 }
 0x3c4   :  { %3788 = vmatpush3.bf16.msra.mxu0 %v4234_v42  ;;  %3206 = vmatprep.subr.bf16.mxu1 %v4237_v43 }
 0x3c5   :  { %3789 = vmatprep.subr.bf16.mxu0 %v4421_v25  ;;  %v3007_v25 = vpack.i.b16 %v3005_v63, %v3005_v63 }
 0x3c7   :  { %3207 = vmatpush1.bf16.msra.mxu1 %v4235_v44  ;;  %v3012_v9 = vrot.slane %v3007_v25, %v4550_v24 }
 0x3c8   :  { %3790 = vmatpush3.bf16.msra.mxu0 %v4238_v46 }
 0x47d   :  { %v3738_v56 = vpop.f32.mrb[24].mxu1 }
 0x47e   :  { %v3760_v48 = vpop.f32.mrb[28].mxu0  ;;  %v3739_v51 = vpop.f32.mrb[25].mxu1 }
 0x47f   :  { %v3740_v57 = vadd.f32 %v3739_v51, %v3738_v56  ;;  %v3761_v58 = vpop.f32.mrb[29].mxu0  ;;  %v3741_v62 = vpop.f32.mrb[26].mxu1 }
 0x480   :  { %v3762_v3 = vadd.f32 %v3761_v58, %v3760_v48  ;;  %v3763_v5 = vpop.f32.mrb[30].mxu0  ;;  %v3742_v1 = vpop.f32.mrb[27].mxu1 }
 0x481   :  { %v3743_v2 = vadd.f32 %v3742_v1, %v3741_v62  ;;  %v3764_v6 = vpop.f32.mrb[31].mxu0 }
 0x482   :  { %v2996_v7 = vadd.f32 %v3762_v3, %v3740_v57  ;;  %v3765_v8 = vadd.f32 %v3764_v6, %v3763_v5 }
 0x484   :  { %v3002_v37 = vadd.f32 %v2996_v7, %v4626_v47  ;;  %v2999_v41 = vadd.f32 %v3765_v8, %v3743_v2  ;;  %v3052_v47 = vrot.slane %v3047_v16, %v4550_v24 }
 0x486   :  { %v3003_v45 = vadd.f32 %v2999_v41, %v4628_v49  ;;  %v3056_v49 = vrot.slane %v3047_v16, %v3055_v27 }
 0x488   :  { %v3004_v4 = vpack.c.bf16 %v3003_v45, %v3002_v37 }
 0x48a   :  { %v3013_v10 = vadd.bf16 %v3012_v9, %v3004_v4 }
 0x48c   :  { %4275 = vtanh.bf16 %v3013_v10 }
 0x497   :  { %v4276_v11 = vpop.eup %4275 }
 0x498   :  { %3225 = vmatmul.mubr.bf16.vlgmr.msra.gmra.mrb[28].mxu1 %v4276_v11  ;;  %3792 = vmatmul.mubr.bf16.vlgmr.msra.gmra.mrb[32].mxu0 %v4276_v11 }
 0x56b   :  { %v3226_v14 = vpop.f32.mrb[28].mxu1  ;;  %v3269_v17 = vpop.f32.mrb[32].mxu0 }
 0x56c   :  { %v3227_v18 = vadd.f32 %v3226_v14, %v3052_v47  ;;  %v3270_v19 = vadd.f32 %v3269_v17, %v3060_v13  ;;  %v3228_v21 = vpop.f32.mrb[29].mxu1  ;;  %v3793_v22 = vpop.f32.mrb[33].mxu0 }
 0x56d   :  { %v3229_v23 = vadd.f32 %v3228_v21, %v3056_v49  ;;  %v3230_v26 = vpop.f32.mrb[30].mxu1  ;;  %v3272_v28 = vpop.f32.mrb[34].mxu0 }
 0x56e   :  { %4277 = vtanh.f32 %v3227_v18  ;;  %v3231_v29 = vadd.f32 %v3230_v26, %v3052_v47  ;;  %v3273_v30 = vadd.f32 %v3272_v28, %v3060_v13  ;;  %v3232_v31 = vpop.f32.mrb[31].mxu1  ;;  %v3794_v32 = vpop.f32.mrb[35].mxu0 }
 0x56f   :  { %4279 = vtanh.f32 %v3270_v19  ;;  %v3233_v15 = vadd.f32 %v3232_v31, %v3056_v49 }
 0x570   :  { %4281 = vtanh.f32 %v3229_v23 }
 0x571   :  { %4283 = vtanh.f32 %v3231_v29 }
 0x572   :  { %4285 = vtanh.f32 %v3273_v30 }
 0x573   :  { %4287 = vtanh.f32 %v3233_v15 }
 0x578   :  { %v4278_v24 = vpop.eup %4277 }
 0x579   :  { %v4280_v33 = vpop.eup %4279  ;;  %3282 = vst [vmem:[#allocation10] sm:$0xff] %v4278_v24 }
 0x57a   :  { %v4282_v34 = vpop.eup %4281  ;;  %3284 = vst [vmem:[#allocation10 + $0x10] sm:$0xff] %v4280_v33 }
 0x57b   :  { %v4284_v35 = vpop.eup %4283  ;;  %3283 = vst [vmem:[#allocation10 + $0x8] sm:$0xff] %v4282_v34 }
 0x57c   :  { %v4286_v36 = vpop.eup %4285  ;;  %3285 = vst [vmem:[#allocation10 + $0x18] sm:$0xff] %v4284_v35 }
 0x57d   :  { %v4288_v38 = vpop.eup %4287  ;;  %3287 = vst [vmem:[#allocation10 + $0x28] sm:$0xff] %v4286_v36 }
 0x57e   :  { %3286 = vst [vmem:[#allocation10 + $0x20] sm:$0xff] %v4288_v38 }
 0x57f   :  { %4388 = shalt.err (!%p4385_p8)
}
 0x580   :  { %s4389_s13 = scalar_lea.hbm %s4684_s9, 768 }
 0x581   :  { %p4390_p9 = scmp.ne.s32.totalorder %s4684_s9, %s4389_s13  ;;  %p4393_p10 = scmp.lt.u32.totalorder %s4389_s13, %s4684_s9 }
 0x583   :  { %p4395_p11 = pnand %p4393_p10, %p4390_p9 }
 0x585   :  { %4398 = shalt.err (!%p4395_p11)
}
 0x586   :  { %3299 = dma.vmem_to_hbm [thread:$0]  %s3294_s29, 768, %s4684_s9, [#allocation4], %s4411_s3, %s4411_s3, %s4412_s10  }
 0x587   :  { %4405 = dma.done.wait [#allocation4], 768  }
 0x588   :  { %4406 = vsyncadd [#allocation4], 4294966528 }
 0x589   :  { %3303 = vsyncpa [#allocation3], 1 }
 0x58a   :  { %3304 = vsyncpa [#allocation6], 1 }
 0x58b   :  { %3305 = vsyncpa [#allocation9], 1 }
 0x58c   :  { %3306 = vsyncpa [#allocation4], 1 }

</bundles_post_ra>
